<compile_context>
chip_gen: v7x
topology: tpu7x:2x2x1
jax: 0.10.0
libtpu: 0.0.40
codegen_flags: <defaults>
</compile_context>

<pallas_src>
import functools

import jax
import jax.numpy as jnp
from jax.experimental import pallas as pl
from jax.experimental.pallas import tpu as pltpu

EPS = 1e-6


# ----------------------------- Pallas kernel ---------------------------------
def jpm_block_kernel(x_ref,
                     ln1_g, ln1_b,
                     w_q, b_q, w_k, b_k, w_v, b_v,
                     head_mask, ones_blk,
                     w_proj, b_proj,
                     ln2_g, ln2_b, w_fc1, b_fc1, w_fc2, b_fc2,
                     lnf_g, lnf_b,
                     o_ref, *, num_heads):
    Bt, S, D = x_ref.shape
    H = num_heads
    HS = H * S
    R = Bt * S

    # Fuse the per-step batch into one row slab for every dense layer.
    x = x_ref[...].reshape(R, D).astype(jnp.float32)              # (R, D)

    def layer_norm(v, g_ref, b_ref):
        # Single-pass LN: mean and E[x^2] together, var = E[x^2] - mu^2.
        mu = jnp.mean(v, axis=-1, keepdims=True)
        ms = jnp.mean(v * v, axis=-1, keepdims=True)
        var = ms - mu * mu
        return (v - mu) * jax.lax.rsqrt(var + EPS) * g_ref[...] + b_ref[...]

    # ---- multi-head self attention ----
    h = layer_norm(x, ln1_g, ln1_b)
    # 1/sqrt(hd) is pre-folded into w_q / b_q in the wrapper.
    q = jnp.dot(h, w_q[...], preferred_element_type=jnp.float32) + b_q[...]   # (R, D)
    k = jnp.dot(h, w_k[...], preferred_element_type=jnp.float32) + b_k[...]   # (R, D)
    v = jnp.dot(h, w_v[...], preferred_element_type=jnp.float32) + b_v[...]   # (R, D)

    # Block-diagonal trick: tile K / V `H` times along the token axis and mask each copy to its
    # head's channel slice.  All heads' scores then come out of a single batched matmul with the
    # head index on the lane axis -> no per-head loop, no sub-lane slices, no head transposes.
    mask = head_mask[...]                                          # (HS, D)
    k3 = k.reshape(Bt, S, D)
    v3 = v.reshape(Bt, S, D)
    kb = jnp.concatenate([k3] * H, axis=1) * mask                  # (Bt, HS, D)
    vb = jnp.concatenate([v3] * H, axis=1) * mask                  # (Bt, HS, D)

    s = jnp.einsum('bqc,blc->bql', q.reshape(Bt, S, D), kb,
                   preferred_element_type=jnp.float32)             # (Bt, S, HS)
    s = s.reshape(R, HS)
    # TODO(synk): stabilization subtracts the row-global max (over all heads); a head whose max
    # logit trails the global max by >~100 would underflow (guarded below) -- fine for any
    # realistic logit range.
    e = jnp.exp(s - jnp.max(s, axis=-1, keepdims=True))
    # Per-head softmax denominator via ONE matmul with a constant block-diagonal ones matrix.
    den = jnp.dot(e, ones_blk[...], preferred_element_type=jnp.float32)       # (R, HS)
    p = e * pl.reciprocal(jnp.maximum(den, 1e-30), approx=True)
    ctx = jnp.einsum('bql,blc->bqc', p.reshape(Bt, S, HS), vb,
                     preferred_element_type=jnp.float32)           # (Bt, S, D) heads lane-concat
    attn = jnp.dot(ctx.reshape(R, D), w_proj[...],
                   preferred_element_type=jnp.float32) + b_proj[...]
    x = x + attn

    # ---- MLP (tanh-GELU; torch nn.GELU uses exact erf -> negligible numeric delta) ----
    h = layer_norm(x, ln2_g, ln2_b)
    h = jnp.dot(h, w_fc1[...], preferred_element_type=jnp.float32) + b_fc1[...]
    h = jax.nn.gelu(h, approximate=True)
    h = jnp.dot(h, w_fc2[...], preferred_element_type=jnp.float32) + b_fc2[...]
    x = x + h

    # ---- trailing LayerNorm (last_layer_norm) ----
    x = layer_norm(x, lnf_g, lnf_b)
    o_ref[...] = x.reshape(Bt, S, D).astype(o_ref.dtype)


# --------------------------- wrapper / heuristics -----------------------------
def _num_tensorcores():
    """Best-effort TensorCore count of the local device (2 on v7x / megacore parts, else 1)."""
    try:
        kind = (jax.devices()[0].device_kind or "").lower()
    except Exception:
        return 1
    if any(tag in kind for tag in ("v7", "7x", "v4", "v5p")):
        return 2
    return 1


def _pick_block_batch(B, n_tc, cap=64):
    """Largest divisor of B (<= cap) whose grid splits evenly over the TensorCores; no padding."""
    divs = [d for d in range(1, min(B, cap) + 1) if B % d == 0]
    pref = [d for d in divs if (B // d) % n_tc == 0]
    return max(pref) if pref else max(divs)


def run_last_block(x, params, num_heads, block_batch=None):
    B, S, D = x.shape
    H = num_heads
    hd = D // H
    HS = H * S

    if block_batch is None:
        # Issue-bound kernel: make the fused (Bt*S, D) row slab as big as possible and only split
        # the grid when a second TensorCore exists to run the other half.
        block_batch = _pick_block_batch(B, _num_tensorcores())
    Bt = int(block_batch)

    pad = (-B) % Bt            # only hit when a non-divisor Bt is forced by the caller
    if pad:
        x = jnp.concatenate([x, jnp.zeros((pad, S, D), x.dtype)], axis=0)
    Bp = B + pad

    # Split the fused QKV weight so q/k/v come straight out of lane-aligned (D, D) matmuls, and
    # fold the 1/sqrt(hd) attention scale into the q weights (zero in-kernel cost).
    scale = 1.0 / (hd ** 0.5)
    w_qkv, b_qkv = params['w_qkv'], params['b_qkv']
    w_q, w_k, w_v = w_qkv[:, :D] * scale, w_qkv[:, D:2 * D], w_qkv[:, 2 * D:]
    b_q, b_k, b_v = b_qkv[:, :D] * scale, b_qkv[:, D:2 * D], b_qkv[:, 2 * D:]

    # Constant masks for the block-diagonal attention formulation.
    row_head = jnp.arange(HS, dtype=jnp.int32) // S
    col_head = jnp.arange(D, dtype=jnp.int32) // hd
    head_mask = (row_head[:, None] == col_head[None, :]).astype(jnp.float32)   # (HS, D)
    ones_blk = (row_head[:, None] == row_head[None, :]).astype(jnp.float32)    # (HS, HS)

    weights = [params['ln1_g'], params['ln1_b'],
               w_q, b_q, w_k, b_k, w_v, b_v,
               head_mask, ones_blk,
               params['w_proj'], params['b_proj'],
               params['ln2_g'], params['ln2_b'],
               params['w_fc1'], params['b_fc1'],
               params['w_fc2'], params['b_fc2'],
               params['lnf_g'], params['lnf_b']]

    def full_spec(a):
        # Constant index_map -> each weight block is DMA'd once.
        # TODO(synk): at real ViT dims (D=768) single-buffer the weights (pl.Buffered(1)) or tile
        # fc1/fc2 over the hidden dim, and consider bf16 weights, to stay inside v7x's 64 MiB VMEM.
        return pl.BlockSpec(a.shape, lambda b, _nd=a.ndim: (0,) * _nd)

    in_specs = [pl.BlockSpec((Bt, S, D), lambda b: (b, 0, 0))] + [full_spec(w) for w in weights]
    out_spec = pl.BlockSpec((Bt, S, D), lambda b: (b, 0, 0))

    kernel = functools.partial(jpm_block_kernel, num_heads=num_heads)
    out = pl.pallas_call(
        kernel,
        out_shape=jax.ShapeDtypeStruct((Bp, S, D), x.dtype),
        grid_spec=pltpu.PrefetchScalarGridSpec(
            num_scalar_prefetch=0,
            grid=(Bp // Bt,),
            in_specs=in_specs,
            out_specs=out_spec),
        compiler_params=pltpu.CompilerParams(
            dimension_semantics=("parallel",),
            vmem_limit_bytes=32 * 1024 * 1024),
    )(x, *weights)
    return out[:B] if pad else out


# ------------------------------- JAX glue -------------------------------------
def shuffle_unit(features, shift, group, begin=1):
    B, L, D = features.shape
    fr = jnp.concatenate(
        [features[:, begin - 1 + shift:], features[:, begin:begin - 1 + shift]], axis=1)
    # TODO(synk): torch's try/except pads with the second-to-last row when the length is not
    # divisible by `group`; not replicated (JPM.forward uses group=1, where the view succeeds).
    x = fr.reshape(B, group, -1, D)
    x = jnp.transpose(x, (0, 2, 1, 3)).reshape(B, -1, D)
    return x


def jpm_forward(x, params, num_heads):
    token = x[:, 0:1]                       # CLS token kept as a length-1 sequence
    feats = x[:, 1:]
    shuffled = shuffle_unit(feats, shift=5, group=1, begin=1)
    xs = jnp.concatenate([token, shuffled], axis=1)
    return run_last_block(xs, params, num_heads)


# Pure-JAX reference (same math) used to sanity-check the kernel.
def _block_ref(x, params, num_heads):
    def ln(v, g, b):
        mu = jnp.mean(v, -1, keepdims=True)
        var = jnp.mean((v - mu) ** 2, -1, keepdims=True)
        return (v - mu) * jax.lax.rsqrt(var + EPS) * g + b

    D = x.shape[-1]
    hd = D // num_heads
    h = ln(x, params['ln1_g'], params['ln1_b'])
    qkv = h @ params['w_qkv'] + params['b_qkv']
    q, k, v = qkv[..., :D], qkv[..., D:2 * D], qkv[..., 2 * D:]

    def heads(t):  # (B,S,D) -> (B,H,S,hd)
        B, S, _ = t.shape
        return jnp.transpose(t.reshape(B, S, num_heads, hd), (0, 2, 1, 3))

    s = jnp.einsum('bhqd,bhkd->bhqk', heads(q), heads(k)) / (hd ** 0.5)
    p = jax.nn.softmax(s, axis=-1)
    ctx = jnp.einsum('bhqk,bhkd->bhqd', p, heads(v))
    ctx = jnp.transpose(ctx, (0, 2, 1, 3)).reshape(x.shape)
    x = x + ctx @ params['w_proj'] + params['b_proj']
    h = ln(x, params['ln2_g'], params['ln2_b'])
    h = jax.nn.gelu(h @ params['w_fc1'] + params['b_fc1'], approximate=True)
    x = x + h @ params['w_fc2'] + params['b_fc2']
    return ln(x, params['lnf_g'], params['lnf_b'])


def _jpm_forward_ref(x, params, num_heads):
    token = x[:, 0:1]
    feats = x[:, 1:]
    shuffled = shuffle_unit(feats, shift=5, group=1, begin=1)
    return _block_ref(jnp.concatenate([token, shuffled], axis=1), params, num_heads)


def init_params(key, D, mlp_hidden):
    ks = jax.random.split(key, 6)
    f32 = jnp.float32
    return {
        'ln1_g': jnp.ones((1, D), f32),
        'ln1_b': jnp.zeros((1, D), f32),
        'w_qkv': (jax.random.normal(ks[0], (D, 3 * D), f32) * 0.02),
        'b_qkv': jnp.zeros((1, 3 * D), f32),
        'w_proj': (jax.random.normal(ks[1], (D, D), f32) * 0.02),
        'b_proj': jnp.zeros((1, D), f32),
        'ln2_g': jnp.ones((1, D), f32),
        'ln2_b': jnp.zeros((1, D), f32),
        'w_fc1': (jax.random.normal(ks[2], (D, mlp_hidden), f32) * 0.02),
        'b_fc1': jnp.zeros((1, mlp_hidden), f32),
        'w_fc2': (jax.random.normal(ks[3], (mlp_hidden, D), f32) * 0.02),
        'b_fc2': jnp.zeros((1, D), f32),
        'lnf_g': jnp.ones((1, D), f32),
        'lnf_b': jnp.zeros((1, D), f32),
    }


if __name__ == "__main__":
    B, N, D = 2, 17, 32            # 1 CLS token + 16 patch tokens, hidden dim 32
    num_heads = 4
    mlp_hidden = 4 * D

    key = jax.random.PRNGKey(0)
    k_x, k_p = jax.random.split(key)
    x = jax.random.normal(k_x, (B, N, D), jnp.float32)
    params = init_params(k_p, D, mlp_hidden)

    out = jax.block_until_ready(jpm_forward(x, params, num_heads))
    ref = _jpm_forward_ref(x, params, num_heads)

    assert out.shape == (B, N - 1, D), out.shape
    # Tolerance loosened slightly vs. exact ref: softmax denom uses the EUP approx reciprocal.
    err = float(jnp.max(jnp.abs(out - ref)))
    assert jnp.allclose(out, ref, atol=5e-4, rtol=5e-4), err
    print("KERNEL_OK")
</pallas_src>

<mosaic_0001>
module attributes {stable_mosaic.version = 11 : i64} {
  func.func @jpm_block_kernel(%arg0: i32, %arg1: memref<2x16x32xf32, #tpu.memory_space<vmem>>, %arg2: memref<1x32xf32, #tpu.memory_space<vmem>>, %arg3: memref<1x32xf32, #tpu.memory_space<vmem>>, %arg4: memref<32x32xf32, #tpu.memory_space<vmem>>, %arg5: memref<1x32xf32, #tpu.memory_space<vmem>>, %arg6: memref<32x32xf32, #tpu.memory_space<vmem>>, %arg7: memref<1x32xf32, #tpu.memory_space<vmem>>, %arg8: memref<32x32xf32, #tpu.memory_space<vmem>>, %arg9: memref<1x32xf32, #tpu.memory_space<vmem>>, %arg10: memref<64x32xf32, #tpu.memory_space<vmem>>, %arg11: memref<64x64xf32, #tpu.memory_space<vmem>>, %arg12: memref<32x32xf32, #tpu.memory_space<vmem>>, %arg13: memref<1x32xf32, #tpu.memory_space<vmem>>, %arg14: memref<1x32xf32, #tpu.memory_space<vmem>>, %arg15: memref<1x32xf32, #tpu.memory_space<vmem>>, %arg16: memref<32x128xf32, #tpu.memory_space<vmem>>, %arg17: memref<1x128xf32, #tpu.memory_space<vmem>>, %arg18: memref<128x32xf32, #tpu.memory_space<vmem>>, %arg19: memref<1x32xf32, #tpu.memory_space<vmem>>, %arg20: memref<1x32xf32, #tpu.memory_space<vmem>>, %arg21: memref<1x32xf32, #tpu.memory_space<vmem>>, %arg22: memref<2x16x32xf32, #tpu.memory_space<vmem>>) attributes {dimension_semantics = [#tpu.dimension_semantics<parallel>], iteration_bounds = array<i64: 1>, scalar_prefetch = 0 : i64, scratch_operands = 0 : i64, tpu.core_type = #tpu.core_type<tc>, window_params = [{transform_indices = @transform_0, window_bounds = array<i64: 2, 16, 32>}, {pipeline_mode = #tpu.pipeline_mode<synchronous>, transform_indices = @transform_1, window_bounds = array<i64: 1, 32>}, {pipeline_mode = #tpu.pipeline_mode<synchronous>, transform_indices = @transform_2, window_bounds = array<i64: 1, 32>}, {pipeline_mode = #tpu.pipeline_mode<synchronous>, transform_indices = @transform_3, window_bounds = array<i64: 32, 32>}, {pipeline_mode = #tpu.pipeline_mode<synchronous>, transform_indices = @transform_4, window_bounds = array<i64: 1, 32>}, {pipeline_mode = #tpu.pipeline_mode<synchronous>, transform_indices = @transform_5, window_bounds = array<i64: 32, 32>}, {pipeline_mode = #tpu.pipeline_mode<synchronous>, transform_indices = @transform_6, window_bounds = array<i64: 1, 32>}, {pipeline_mode = #tpu.pipeline_mode<synchronous>, transform_indices = @transform_7, window_bounds = array<i64: 32, 32>}, {pipeline_mode = #tpu.pipeline_mode<synchronous>, transform_indices = @transform_8, window_bounds = array<i64: 1, 32>}, {pipeline_mode = #tpu.pipeline_mode<synchronous>, transform_indices = @transform_9, window_bounds = array<i64: 64, 32>}, {pipeline_mode = #tpu.pipeline_mode<synchronous>, transform_indices = @transform_10, window_bounds = array<i64: 64, 64>}, {pipeline_mode = #tpu.pipeline_mode<synchronous>, transform_indices = @transform_11, window_bounds = array<i64: 32, 32>}, {pipeline_mode = #tpu.pipeline_mode<synchronous>, transform_indices = @transform_12, window_bounds = array<i64: 1, 32>}, {pipeline_mode = #tpu.pipeline_mode<synchronous>, transform_indices = @transform_13, window_bounds = array<i64: 1, 32>}, {pipeline_mode = #tpu.pipeline_mode<synchronous>, transform_indices = @transform_14, window_bounds = array<i64: 1, 32>}, {pipeline_mode = #tpu.pipeline_mode<synchronous>, transform_indices = @transform_15, window_bounds = array<i64: 32, 128>}, {pipeline_mode = #tpu.pipeline_mode<synchronous>, transform_indices = @transform_16, window_bounds = array<i64: 1, 128>}, {pipeline_mode = #tpu.pipeline_mode<synchronous>, transform_indices = @transform_17, window_bounds = array<i64: 128, 32>}, {pipeline_mode = #tpu.pipeline_mode<synchronous>, transform_indices = @transform_18, window_bounds = array<i64: 1, 32>}, {pipeline_mode = #tpu.pipeline_mode<synchronous>, transform_indices = @transform_19, window_bounds = array<i64: 1, 32>}, {pipeline_mode = #tpu.pipeline_mode<synchronous>, transform_indices = @transform_20, window_bounds = array<i64: 1, 32>}, {transform_indices = @transform_21, window_bounds = array<i64: 2, 16, 32>}]} {
    %c0 = arith.constant 0 : index
    %c0_0 = arith.constant 0 : index
    %c0_1 = arith.constant 0 : index
    %0 = vector.load %arg1[%c0, %c0_0, %c0_1] : memref<2x16x32xf32, #tpu.memory_space<vmem>>, vector<2x16x32xf32>
    %1 = vector.shape_cast %0 : vector<2x16x32xf32> to vector<32x32xf32>
    %cst = arith.constant dense<0.000000e+00> : vector<32xf32>
    %2 = vector.multi_reduction <add>, %1, %cst [1] : vector<32x32xf32> to vector<32xf32>
    %3 = vector.shape_cast %2 : vector<32xf32> to vector<32x1xf32>
    %cst_2 = arith.constant 3.200000e+01 : f32
    %4 = vector.broadcast %cst_2 : f32 to vector<32x1xf32>
    %5 = arith.divf %3, %4 : vector<32x1xf32>
    %6 = arith.mulf %1, %1 : vector<32x32xf32>
    %cst_3 = arith.constant dense<0.000000e+00> : vector<32xf32>
    %7 = vector.multi_reduction <add>, %6, %cst_3 [1] : vector<32x32xf32> to vector<32xf32>
    %8 = vector.shape_cast %7 : vector<32xf32> to vector<32x1xf32>
    %cst_4 = arith.constant 3.200000e+01 : f32
    %9 = vector.broadcast %cst_4 : f32 to vector<32x1xf32>
    %10 = arith.divf %8, %9 : vector<32x1xf32>
    %11 = arith.mulf %5, %5 : vector<32x1xf32>
    %12 = arith.subf %10, %11 : vector<32x1xf32>
    %13 = vector.broadcast %5 : vector<32x1xf32> to vector<32x32xf32>
    %14 = arith.subf %1, %13 : vector<32x32xf32>
    %cst_5 = arith.constant 9.99999997E-7 : f32
    %15 = vector.broadcast %cst_5 : f32 to vector<32x1xf32>
    %16 = arith.addf %12, %15 : vector<32x1xf32>
    %17 = math.rsqrt %16 : vector<32x1xf32>
    %18 = vector.broadcast %17 : vector<32x1xf32> to vector<32x32xf32>
    %19 = arith.mulf %14, %18 : vector<32x32xf32>
    %c0_6 = arith.constant 0 : index
    %c0_7 = arith.constant 0 : index
    %20 = vector.load %arg2[%c0_6, %c0_7] : memref<1x32xf32, #tpu.memory_space<vmem>>, vector<1x32xf32>
    %21 = vector.broadcast %20 : vector<1x32xf32> to vector<32x32xf32>
    %22 = arith.mulf %19, %21 : vector<32x32xf32>
    %c0_8 = arith.constant 0 : index
    %c0_9 = arith.constant 0 : index
    %23 = vector.load %arg3[%c0_8, %c0_9] : memref<1x32xf32, #tpu.memory_space<vmem>>, vector<1x32xf32>
    %24 = vector.broadcast %23 : vector<1x32xf32> to vector<32x32xf32>
    %25 = arith.addf %22, %24 : vector<32x32xf32>
    %c0_10 = arith.constant 0 : index
    %c0_11 = arith.constant 0 : index
    %26 = vector.load %arg4[%c0_10, %c0_11] : memref<32x32xf32, #tpu.memory_space<vmem>>, vector<32x32xf32>
    %cst_12 = arith.constant dense<0.000000e+00> : vector<32x32xf32>
    %27 = tpu.matmul %25, %26, %cst_12 {dimension_numbers = #tpu.dot_dimension_numbers<[1], [0], [0], [1], [0, 0, 1, 1], [], []>} : vector<32x32xf32>, vector<32x32xf32>, vector<32x32xf32> -> vector<32x32xf32>
    %c0_13 = arith.constant 0 : index
    %c0_14 = arith.constant 0 : index
    %28 = vector.load %arg5[%c0_13, %c0_14] : memref<1x32xf32, #tpu.memory_space<vmem>>, vector<1x32xf32>
    %29 = vector.broadcast %28 : vector<1x32xf32> to vector<32x32xf32>
    %30 = arith.addf %27, %29 : vector<32x32xf32>
    %c0_15 = arith.constant 0 : index
    %c0_16 = arith.constant 0 : index
    %31 = vector.load %arg6[%c0_15, %c0_16] : memref<32x32xf32, #tpu.memory_space<vmem>>, vector<32x32xf32>
    %cst_17 = arith.constant dense<0.000000e+00> : vector<32x32xf32>
    %32 = tpu.matmul %25, %31, %cst_17 {dimension_numbers = #tpu.dot_dimension_numbers<[1], [0], [0], [1], [0, 0, 1, 1], [], []>} : vector<32x32xf32>, vector<32x32xf32>, vector<32x32xf32> -> vector<32x32xf32>
    %c0_18 = arith.constant 0 : index
    %c0_19 = arith.constant 0 : index
    %33 = vector.load %arg7[%c0_18, %c0_19] : memref<1x32xf32, #tpu.memory_space<vmem>>, vector<1x32xf32>
    %34 = vector.broadcast %33 : vector<1x32xf32> to vector<32x32xf32>
    %35 = arith.addf %32, %34 : vector<32x32xf32>
    %c0_20 = arith.constant 0 : index
    %c0_21 = arith.constant 0 : index
    %36 = vector.load %arg8[%c0_20, %c0_21] : memref<32x32xf32, #tpu.memory_space<vmem>>, vector<32x32xf32>
    %cst_22 = arith.constant dense<0.000000e+00> : vector<32x32xf32>
    %37 = tpu.matmul %25, %36, %cst_22 {dimension_numbers = #tpu.dot_dimension_numbers<[1], [0], [0], [1], [0, 0, 1, 1], [], []>} : vector<32x32xf32>, vector<32x32xf32>, vector<32x32xf32> -> vector<32x32xf32>
    %c0_23 = arith.constant 0 : index
    %c0_24 = arith.constant 0 : index
    %38 = vector.load %arg9[%c0_23, %c0_24] : memref<1x32xf32, #tpu.memory_space<vmem>>, vector<1x32xf32>
    %39 = vector.broadcast %38 : vector<1x32xf32> to vector<32x32xf32>
    %40 = arith.addf %37, %39 : vector<32x32xf32>
    %c0_25 = arith.constant 0 : index
    %c0_26 = arith.constant 0 : index
    %41 = vector.load %arg10[%c0_25, %c0_26] : memref<64x32xf32, #tpu.memory_space<vmem>>, vector<64x32xf32>
    %42 = vector.shape_cast %35 : vector<32x32xf32> to vector<2x16x32xf32>
    %43 = vector.shape_cast %40 : vector<32x32xf32> to vector<2x16x32xf32>
    %44 = tpu.concatenate %42, %42, %42, %42 in 1 : vector<2x16x32xf32>, vector<2x16x32xf32>, vector<2x16x32xf32>, vector<2x16x32xf32> -> vector<2x64x32xf32>
    %45 = vector.shape_cast %41 : vector<64x32xf32> to vector<1x64x32xf32>
    %46 = vector.broadcast %45 : vector<1x64x32xf32> to vector<2x64x32xf32>
    %47 = arith.mulf %44, %46 : vector<2x64x32xf32>
    %48 = tpu.concatenate %43, %43, %43, %43 in 1 : vector<2x16x32xf32>, vector<2x16x32xf32>, vector<2x16x32xf32>, vector<2x16x32xf32> -> vector<2x64x32xf32>
    %49 = vector.shape_cast %41 : vector<64x32xf32> to vector<1x64x32xf32>
    %50 = vector.broadcast %49 : vector<1x64x32xf32> to vector<2x64x32xf32>
    %51 = arith.mulf %48, %50 : vector<2x64x32xf32>
    %52 = vector.shape_cast %30 : vector<32x32xf32> to vector<2x16x32xf32>
    "tpu.trace_start"() <{level = 10 : i32, message = "bqc,blc->bql"}> : () -> ()
    %cst_27 = arith.constant dense<0.000000e+00> : vector<2x16x64xf32>
    %53 = tpu.matmul %52, %47, %cst_27 {dimension_numbers = #tpu.dot_dimension_numbers<[2], [2], [1], [1], [0, 0, 0, 1, 1, 1], [0], [0]>} : vector<2x16x32xf32>, vector<2x64x32xf32>, vector<2x16x64xf32> -> vector<2x16x64xf32>
    "tpu.trace_stop"() : () -> ()
    %54 = vector.shape_cast %53 : vector<2x16x64xf32> to vector<32x64xf32>
    %cst_28 = arith.constant dense<0xFF800000> : vector<32xf32>
    %55 = vector.multi_reduction <maximumf>, %54, %cst_28 [1] : vector<32x64xf32> to vector<32xf32>
    %56 = vector.shape_cast %55 : vector<32xf32> to vector<32x1xf32>
    %57 = vector.broadcast %56 : vector<32x1xf32> to vector<32x64xf32>
    %58 = arith.subf %54, %57 : vector<32x64xf32>
    %59 = math.exp %58 : vector<32x64xf32>
    %c0_29 = arith.constant 0 : index
    %c0_30 = arith.constant 0 : index
    %60 = vector.load %arg11[%c0_29, %c0_30] : memref<64x64xf32, #tpu.memory_space<vmem>>, vector<64x64xf32>
    %cst_31 = arith.constant dense<0.000000e+00> : vector<32x64xf32>
    %61 = tpu.matmul %59, %60, %cst_31 {dimension_numbers = #tpu.dot_dimension_numbers<[1], [0], [0], [1], [0, 0, 1, 1], [], []>} : vector<32x64xf32>, vector<64x64xf32>, vector<32x64xf32> -> vector<32x64xf32>
    %cst_32 = arith.constant 1.000000e-30 : f32
    %62 = vector.broadcast %cst_32 : f32 to vector<32x64xf32>
    %63 = arith.maximumf %61, %62 : vector<32x64xf32>
    %64 = tpu.reciprocal %63 {approx = true} : vector<32x64xf32> -> vector<32x64xf32>
    %65 = arith.mulf %59, %64 : vector<32x64xf32>
    %66 = vector.shape_cast %65 : vector<32x64xf32> to vector<2x16x64xf32>
    "tpu.trace_start"() <{level = 10 : i32, message = "bql,blc->bqc"}> : () -> ()
    %cst_33 = arith.constant dense<0.000000e+00> : vector<2x16x32xf32>
    %67 = tpu.matmul %66, %51, %cst_33 {dimension_numbers = #tpu.dot_dimension_numbers<[2], [1], [1], [2], [0, 0, 0, 1, 1, 2], [0], [0]>} : vector<2x16x64xf32>, vector<2x64x32xf32>, vector<2x16x32xf32> -> vector<2x16x32xf32>
    "tpu.trace_stop"() : () -> ()
    %68 = vector.shape_cast %67 : vector<2x16x32xf32> to vector<32x32xf32>
    %c0_34 = arith.constant 0 : index
    %c0_35 = arith.constant 0 : index
    %69 = vector.load %arg12[%c0_34, %c0_35] : memref<32x32xf32, #tpu.memory_space<vmem>>, vector<32x32xf32>
    %cst_36 = arith.constant dense<0.000000e+00> : vector<32x32xf32>
    %70 = tpu.matmul %68, %69, %cst_36 {dimension_numbers = #tpu.dot_dimension_numbers<[1], [0], [0], [1], [0, 0, 1, 1], [], []>} : vector<32x32xf32>, vector<32x32xf32>, vector<32x32xf32> -> vector<32x32xf32>
    %c0_37 = arith.constant 0 : index
    %c0_38 = arith.constant 0 : index
    %71 = vector.load %arg13[%c0_37, %c0_38] : memref<1x32xf32, #tpu.memory_space<vmem>>, vector<1x32xf32>
    %72 = vector.broadcast %71 : vector<1x32xf32> to vector<32x32xf32>
    %73 = arith.addf %70, %72 : vector<32x32xf32>
    %74 = arith.addf %1, %73 : vector<32x32xf32>
    %cst_39 = arith.constant dense<0.000000e+00> : vector<32xf32>
    %75 = vector.multi_reduction <add>, %74, %cst_39 [1] : vector<32x32xf32> to vector<32xf32>
    %76 = vector.shape_cast %75 : vector<32xf32> to vector<32x1xf32>
    %cst_40 = arith.constant 3.200000e+01 : f32
    %77 = vector.broadcast %cst_40 : f32 to vector<32x1xf32>
    %78 = arith.divf %76, %77 : vector<32x1xf32>
    %79 = arith.mulf %74, %74 : vector<32x32xf32>
    %cst_41 = arith.constant dense<0.000000e+00> : vector<32xf32>
    %80 = vector.multi_reduction <add>, %79, %cst_41 [1] : vector<32x32xf32> to vector<32xf32>
    %81 = vector.shape_cast %80 : vector<32xf32> to vector<32x1xf32>
    %cst_42 = arith.constant 3.200000e+01 : f32
    %82 = vector.broadcast %cst_42 : f32 to vector<32x1xf32>
    %83 = arith.divf %81, %82 : vector<32x1xf32>
    %84 = arith.mulf %78, %78 : vector<32x1xf32>
    %85 = arith.subf %83, %84 : vector<32x1xf32>
    %86 = vector.broadcast %78 : vector<32x1xf32> to vector<32x32xf32>
    %87 = arith.subf %74, %86 : vector<32x32xf32>
    %cst_43 = arith.constant 9.99999997E-7 : f32
    %88 = vector.broadcast %cst_43 : f32 to vector<32x1xf32>
    %89 = arith.addf %85, %88 : vector<32x1xf32>
    %90 = math.rsqrt %89 : vector<32x1xf32>
    %91 = vector.broadcast %90 : vector<32x1xf32> to vector<32x32xf32>
    %92 = arith.mulf %87, %91 : vector<32x32xf32>
    %c0_44 = arith.constant 0 : index
    %c0_45 = arith.constant 0 : index
    %93 = vector.load %arg14[%c0_44, %c0_45] : memref<1x32xf32, #tpu.memory_space<vmem>>, vector<1x32xf32>
    %94 = vector.broadcast %93 : vector<1x32xf32> to vector<32x32xf32>
    %95 = arith.mulf %92, %94 : vector<32x32xf32>
    %c0_46 = arith.constant 0 : index
    %c0_47 = arith.constant 0 : index
    %96 = vector.load %arg15[%c0_46, %c0_47] : memref<1x32xf32, #tpu.memory_space<vmem>>, vector<1x32xf32>
    %97 = vector.broadcast %96 : vector<1x32xf32> to vector<32x32xf32>
    %98 = arith.addf %95, %97 : vector<32x32xf32>
    %c0_48 = arith.constant 0 : index
    %c0_49 = arith.constant 0 : index
    %99 = vector.load %arg16[%c0_48, %c0_49] : memref<32x128xf32, #tpu.memory_space<vmem>>, vector<32x128xf32>
    %cst_50 = arith.constant dense<0.000000e+00> : vector<32x128xf32>
    %100 = tpu.matmul %98, %99, %cst_50 {dimension_numbers = #tpu.dot_dimension_numbers<[1], [0], [0], [1], [0, 0, 1, 1], [], []>} : vector<32x32xf32>, vector<32x128xf32>, vector<32x128xf32> -> vector<32x128xf32>
    %c0_51 = arith.constant 0 : index
    %c0_52 = arith.constant 0 : index
    %101 = vector.load %arg17[%c0_51, %c0_52] : memref<1x128xf32, #tpu.memory_space<vmem>>, vector<1x128xf32>
    %102 = vector.broadcast %101 : vector<1x128xf32> to vector<32x128xf32>
    %103 = arith.addf %100, %102 : vector<32x128xf32>
    %104 = arith.mulf %103, %103 : vector<32x128xf32>
    %105 = arith.mulf %103, %104 : vector<32x128xf32>
    %cst_53 = arith.constant 4.471500e-02 : f32
    %106 = vector.broadcast %cst_53 : f32 to vector<32x128xf32>
    %107 = arith.mulf %106, %105 : vector<32x128xf32>
    %108 = arith.addf %103, %107 : vector<32x128xf32>
    %cst_54 = arith.constant 0.797884583 : f32
    %109 = vector.broadcast %cst_54 : f32 to vector<32x128xf32>
    %110 = arith.mulf %109, %108 : vector<32x128xf32>
    %111 = math.tanh %110 : vector<32x128xf32>
    %cst_55 = arith.constant 1.000000e+00 : f32
    %112 = vector.broadcast %cst_55 : f32 to vector<32x128xf32>
    %113 = arith.addf %112, %111 : vector<32x128xf32>
    %cst_56 = arith.constant 5.000000e-01 : f32
    %114 = vector.broadcast %cst_56 : f32 to vector<32x128xf32>
    %115 = arith.mulf %114, %113 : vector<32x128xf32>
    %116 = arith.mulf %103, %115 : vector<32x128xf32>
    %c0_57 = arith.constant 0 : index
    %c0_58 = arith.constant 0 : index
    %117 = vector.load %arg18[%c0_57, %c0_58] : memref<128x32xf32, #tpu.memory_space<vmem>>, vector<128x32xf32>
    %cst_59 = arith.constant dense<0.000000e+00> : vector<32x32xf32>
    %118 = tpu.matmul %116, %117, %cst_59 {dimension_numbers = #tpu.dot_dimension_numbers<[1], [0], [0], [1], [0, 0, 1, 1], [], []>} : vector<32x128xf32>, vector<128x32xf32>, vector<32x32xf32> -> vector<32x32xf32>
    %c0_60 = arith.constant 0 : index
    %c0_61 = arith.constant 0 : index
    %119 = vector.load %arg19[%c0_60, %c0_61] : memref<1x32xf32, #tpu.memory_space<vmem>>, vector<1x32xf32>
    %120 = vector.broadcast %119 : vector<1x32xf32> to vector<32x32xf32>
    %121 = arith.addf %118, %120 : vector<32x32xf32>
    %122 = arith.addf %74, %121 : vector<32x32xf32>
    %cst_62 = arith.constant dense<0.000000e+00> : vector<32xf32>
    %123 = vector.multi_reduction <add>, %122, %cst_62 [1] : vector<32x32xf32> to vector<32xf32>
    %124 = vector.shape_cast %123 : vector<32xf32> to vector<32x1xf32>
    %cst_63 = arith.constant 3.200000e+01 : f32
    %125 = vector.broadcast %cst_63 : f32 to vector<32x1xf32>
    %126 = arith.divf %124, %125 : vector<32x1xf32>
    %127 = arith.mulf %122, %122 : vector<32x32xf32>
    %cst_64 = arith.constant dense<0.000000e+00> : vector<32xf32>
    %128 = vector.multi_reduction <add>, %127, %cst_64 [1] : vector<32x32xf32> to vector<32xf32>
    %129 = vector.shape_cast %128 : vector<32xf32> to vector<32x1xf32>
    %cst_65 = arith.constant 3.200000e+01 : f32
    %130 = vector.broadcast %cst_65 : f32 to vector<32x1xf32>
    %131 = arith.divf %129, %130 : vector<32x1xf32>
    %132 = arith.mulf %126, %126 : vector<32x1xf32>
    %133 = arith.subf %131, %132 : vector<32x1xf32>
    %134 = vector.broadcast %126 : vector<32x1xf32> to vector<32x32xf32>
    %135 = arith.subf %122, %134 : vector<32x32xf32>
    %cst_66 = arith.constant 9.99999997E-7 : f32
    %136 = vector.broadcast %cst_66 : f32 to vector<32x1xf32>
    %137 = arith.addf %133, %136 : vector<32x1xf32>
    %138 = math.rsqrt %137 : vector<32x1xf32>
    %139 = vector.broadcast %138 : vector<32x1xf32> to vector<32x32xf32>
    %140 = arith.mulf %135, %139 : vector<32x32xf32>
    %c0_67 = arith.constant 0 : index
    %c0_68 = arith.constant 0 : index
    %141 = vector.load %arg20[%c0_67, %c0_68] : memref<1x32xf32, #tpu.memory_space<vmem>>, vector<1x32xf32>
    %142 = vector.broadcast %141 : vector<1x32xf32> to vector<32x32xf32>
    %143 = arith.mulf %140, %142 : vector<32x32xf32>
    %c0_69 = arith.constant 0 : index
    %c0_70 = arith.constant 0 : index
    %144 = vector.load %arg21[%c0_69, %c0_70] : memref<1x32xf32, #tpu.memory_space<vmem>>, vector<1x32xf32>
    %145 = vector.broadcast %144 : vector<1x32xf32> to vector<32x32xf32>
    %146 = arith.addf %143, %145 : vector<32x32xf32>
    %147 = vector.shape_cast %146 : vector<32x32xf32> to vector<2x16x32xf32>
    %c0_71 = arith.constant 0 : index
    %c0_72 = arith.constant 0 : index
    %c0_73 = arith.constant 0 : index
    %148 = vector.load %arg22[%c0_71, %c0_72, %c0_73] : memref<2x16x32xf32, #tpu.memory_space<vmem>>, vector<2x16x32xf32>
    tpu.vector_store %arg22[%c0_71, %c0_72, %c0_73], %147 {strides = array<i32>} : memref<2x16x32xf32, #tpu.memory_space<vmem>>, vector<2x16x32xf32>,
    return
  }
  func.func @transform_0(%arg0: i32) -> (i32, i32, i32) {
    %c0_i32 = arith.constant 0 : i32
    %c0_i32_0 = arith.constant 0 : i32
    %c0_i32_1 = arith.constant 0 : i32
    return %arg0, %c0_i32, %c0_i32_0 : i32, i32, i32
  }
  func.func @transform_1(%arg0: i32) -> (i32, i32) {
    %c0_i32 = arith.constant 0 : i32
    %c0_i32_0 = arith.constant 0 : i32
    %c0_i32_1 = arith.constant 0 : i32
    return %c0_i32, %c0_i32_0 : i32, i32
  }
  func.func @transform_2(%arg0: i32) -> (i32, i32) {
    %c0_i32 = arith.constant 0 : i32
    %c0_i32_0 = arith.constant 0 : i32
    %c0_i32_1 = arith.constant 0 : i32
    return %c0_i32, %c0_i32_0 : i32, i32
  }
  func.func @transform_3(%arg0: i32) -> (i32, i32) {
    %c0_i32 = arith.constant 0 : i32
    %c0_i32_0 = arith.constant 0 : i32
    %c0_i32_1 = arith.constant 0 : i32
    return %c0_i32, %c0_i32_0 : i32, i32
  }
  func.func @transform_4(%arg0: i32) -> (i32, i32) {
    %c0_i32 = arith.constant 0 : i32
    %c0_i32_0 = arith.constant 0 : i32
    %c0_i32_1 = arith.constant 0 : i32
    return %c0_i32, %c0_i32_0 : i32, i32
  }
  func.func @transform_5(%arg0: i32) -> (i32, i32) {
    %c0_i32 = arith.constant 0 : i32
    %c0_i32_0 = arith.constant 0 : i32
    %c0_i32_1 = arith.constant 0 : i32
    return %c0_i32, %c0_i32_0 : i32, i32
  }
  func.func @transform_6(%arg0: i32) -> (i32, i32) {
    %c0_i32 = arith.constant 0 : i32
    %c0_i32_0 = arith.constant 0 : i32
    %c0_i32_1 = arith.constant 0 : i32
    return %c0_i32, %c0_i32_0 : i32, i32
  }
  func.func @transform_7(%arg0: i32) -> (i32, i32) {
    %c0_i32 = arith.constant 0 : i32
    %c0_i32_0 = arith.constant 0 : i32
    %c0_i32_1 = arith.constant 0 : i32
    return %c0_i32, %c0_i32_0 : i32, i32
  }
  func.func @transform_8(%arg0: i32) -> (i32, i32) {
    %c0_i32 = arith.constant 0 : i32
    %c0_i32_0 = arith.constant 0 : i32
    %c0_i32_1 = arith.constant 0 : i32
    return %c0_i32, %c0_i32_0 : i32, i32
  }
  func.func @transform_9(%arg0: i32) -> (i32, i32) {
    %c0_i32 = arith.constant 0 : i32
    %c0_i32_0 = arith.constant 0 : i32
    %c0_i32_1 = arith.constant 0 : i32
    return %c0_i32, %c0_i32_0 : i32, i32
  }
  func.func @transform_10(%arg0: i32) -> (i32, i32) {
    %c0_i32 = arith.constant 0 : i32
    %c0_i32_0 = arith.constant 0 : i32
    %c0_i32_1 = arith.constant 0 : i32
    return %c0_i32, %c0_i32_0 : i32, i32
  }
  func.func @transform_11(%arg0: i32) -> (i32, i32) {
    %c0_i32 = arith.constant 0 : i32
    %c0_i32_0 = arith.constant 0 : i32
    %c0_i32_1 = arith.constant 0 : i32
    return %c0_i32, %c0_i32_0 : i32, i32
  }
  func.func @transform_12(%arg0: i32) -> (i32, i32) {
    %c0_i32 = arith.constant 0 : i32
    %c0_i32_0 = arith.constant 0 : i32
    %c0_i32_1 = arith.constant 0 : i32
    return %c0_i32, %c0_i32_0 : i32, i32
  }
  func.func @transform_13(%arg0: i32) -> (i32, i32) {
    %c0_i32 = arith.constant 0 : i32
    %c0_i32_0 = arith.constant 0 : i32
    %c0_i32_1 = arith.constant 0 : i32
    return %c0_i32, %c0_i32_0 : i32, i32
  }
  func.func @transform_14(%arg0: i32) -> (i32, i32) {
    %c0_i32 = arith.constant 0 : i32
    %c0_i32_0 = arith.constant 0 : i32
    %c0_i32_1 = arith.constant 0 : i32
    return %c0_i32, %c0_i32_0 : i32, i32
  }
  func.func @transform_15(%arg0: i32) -> (i32, i32) {
    %c0_i32 = arith.constant 0 : i32
    %c0_i32_0 = arith.constant 0 : i32
    %c0_i32_1 = arith.constant 0 : i32
    return %c0_i32, %c0_i32_0 : i32, i32
  }
  func.func @transform_16(%arg0: i32) -> (i32, i32) {
    %c0_i32 = arith.constant 0 : i32
    %c0_i32_0 = arith.constant 0 : i32
    %c0_i32_1 = arith.constant 0 : i32
    return %c0_i32, %c0_i32_0 : i32, i32
  }
  func.func @transform_17(%arg0: i32) -> (i32, i32) {
    %c0_i32 = arith.constant 0 : i32
    %c0_i32_0 = arith.constant 0 : i32
    %c0_i32_1 = arith.constant 0 : i32
    return %c0_i32, %c0_i32_0 : i32, i32
  }
  func.func @transform_18(%arg0: i32) -> (i32, i32) {
    %c0_i32 = arith.constant 0 : i32
    %c0_i32_0 = arith.constant 0 : i32
    %c0_i32_1 = arith.constant 0 : i32
    return %c0_i32, %c0_i32_0 : i32, i32
  }
  func.func @transform_19(%arg0: i32) -> (i32, i32) {
    %c0_i32 = arith.constant 0 : i32
    %c0_i32_0 = arith.constant 0 : i32
    %c0_i32_1 = arith.constant 0 : i32
    return %c0_i32, %c0_i32_0 : i32, i32
  }
  func.func @transform_20(%arg0: i32) -> (i32, i32) {
    %c0_i32 = arith.constant 0 : i32
    %c0_i32_0 = arith.constant 0 : i32
    %c0_i32_1 = arith.constant 0 : i32
    return %c0_i32, %c0_i32_0 : i32, i32
  }
  func.func @transform_21(%arg0: i32) -> (i32, i32, i32) {
    %c0_i32 = arith.constant 0 : i32
    %c0_i32_0 = arith.constant 0 : i32
    %c0_i32_1 = arith.constant 0 : i32
    return %arg0, %c0_i32, %c0_i32_0 : i32, i32, i32
  }
}

</mosaic_0001>

<bundles_post_ra>
// kernel: tpu_custom_call.1
= control target key start
LH: loop header
LB: loop body
LE: loop exit
PB: predicated region body
PF: predicated region fallthrough
CT: control target
= control target key end

     0   :  { %s2965_s0 = inlined_call_operand.vmem [shape: f32[2,16,32], index: 0, kind: input, shape index: {}]   ;;  %s2966_s1 = inlined_call_operand.vmem [shape: f32[1,32], index: 1, kind: input, shape index: {}]   ;;  %s2967_s2 = inlined_call_operand.vmem [shape: f32[1,32], index: 2, kind: input, shape index: {}]   ;;  %s2968_s3 = inlined_call_operand.vmem [shape: f32[32,32], index: 3, kind: input, shape index: {}]   ;;  %s2969_s4 = inlined_call_operand.hbm [shape: f32[1,32], index: 4, kind: input, shape index: {}]   ;;  %s2970_s5 = inlined_call_operand.vmem [shape: f32[32,32], index: 5, kind: input, shape index: {}]   ;;  %s2971_s6 = inlined_call_operand.hbm [shape: f32[1,32], index: 6, kind: input, shape index: {}]   ;;  %s2972_s7 = inlined_call_operand.vmem [shape: f32[32,32], index: 7, kind: input, shape index: {}]   ;;  %s2973_s8 = inlined_call_operand.hbm [shape: f32[1,32], index: 8, kind: input, shape index: {}]   ;;  %s2974_s9 = inlined_call_operand.vmem [shape: f32[64,32], index: 9, kind: input, shape index: {}]   ;;  %s2975_s10 = inlined_call_operand.vmem [shape: f32[64,64], index: 10, kind: input, shape index: {}]   ;;  %s2976_s11 = inlined_call_operand.vmem [shape: f32[32,32], index: 11, kind: input, shape index: {}]   ;;  %s2977_s12 = inlined_call_operand.vmem [shape: f32[1,32], index: 12, kind: input, shape index: {}]   ;;  %s2978_s13 = inlined_call_operand.vmem [shape: f32[1,32], index: 13, kind: input, shape index: {}]   ;;  %s2979_s14 = inlined_call_operand.vmem [shape: f32[1,32], index: 14, kind: input, shape index: {}]   ;;  %s2980_s15 = inlined_call_operand.hbm [shape: f32[32,128], index: 15, kind: input, shape index: {}]   ;;  %s2981_s16 = inlined_call_operand.vmem [shape: f32[1,128], index: 16, kind: input, shape index: {}]   ;;  %s2982_s17 = inlined_call_operand.vmem [shape: f32[128,32], index: 17, kind: input, shape index: {}]   ;;  %s2983_s18 = inlined_call_operand.vmem [shape: f32[1,32], index: 18, kind: input, shape index: {}]   ;;  %s2984_s19 = inlined_call_operand.vmem [shape: f32[1,32], index: 19, kind: input, shape index: {}]   ;;  %s2985_s20 = inlined_call_operand.vmem [shape: f32[1,32], index: 20, kind: input, shape index: {}]   ;;  %s2986_s21 = inlined_call_operand.hbm [shape: f32[2,16,32], index: 21, kind: output, shape index: {}]  }
   0x1   :  { %2991 = sst [smem:[#allocation15_spill]] %s2965_s0 }
   0x2   :  { %2992 = sst [smem:[#allocation16_spill]] %s2966_s1 }
   0x3   :  { %2993 = sst [smem:[#allocation17_spill]] %s2967_s2 }
   0x4   :  { %2994 = sst [smem:[#allocation18_spill]] %s2968_s3 }
   0x5   :  { %2995 = sst [smem:[#allocation19_spill]] %s2969_s4 }
   0x6   :  { %2996 = sst [smem:[#allocation20_spill]] %s2970_s5 }
   0x7   :  { %26 = vsyncpa [#allocation3], 0 }
   0x8   :  { %27 = vsyncpa [#allocation6], 0 }
   0x9   :  { %28 = vsyncpa [#allocation9], 0 }
   0xa   :  { %29 = vsyncpa [#allocation4], 0  ;;  %s2334_s2 = smov [#allocation5]   ;;  %s2335_s26 = smov [#allocation2]  }
   0xb   :  { %s56_s25 = sshll.u32 %s2334_s2, 4  ;;  %s44_s27 = sshll.u32 %s2335_s26, 4  ;;  %s57_s25 = int_to_ptr.vmem [resolvable:$true] %s56_s25  ;;  %s45_s27 = int_to_ptr.vmem [resolvable:$true] %s44_s27 }
   0xc   :  { %s2216_s29 = scalar_lea.hbm %s2971_s6, 16 }
   0xd   :  { %p2217_p0 = scmp.ne.s32.totalorder %s2971_s6, %s2216_s29  ;;  %p2220_p1 = scmp.lt.u32.totalorder %s2216_s29, %s2971_s6 }
   0xf   :  { %p2222_p2 = pnand %p2220_p1, %p2217_p0 }
  0x11   :  { %2225 = shalt.err (!%p2222_p2)
}
  0x12   :  { %s2226_s22 = scalar_lea.vmem %s57_s25, 16  ;;  %s2230_s23 = scalar_lea.vmem %s57_s25, 32 }
  0x13   :  { %p2227_p3 = scmp.ne.s32.totalorder %s57_s25, %s2226_s22  ;;  %p2231_p4 = scmp.lt.s32.totalorder %s57_s25, %s57_s25 }
  0x14   :  { %p2232_p5 = scmp.lt.s32.totalorder %s2230_s23, %s2226_s22 }
  0x16   :  { %p2233_p6 = por %p2232_p5, %p2231_p4 }
  0x18   :  { %p2234_p7 = pnand %p2233_p6, %p2227_p3 }
  0x1a   :  { %2237 = shalt.err (!%p2234_p7)
}
  0x1b   :  { %59 = dma.hbm_to_vmem [thread:$0]  %s2971_s6, 16, %s57_s25, [#allocation6]  }
  0x1c   :  { %s2997_s3 = sld [smem:[#allocation19_spill]] }
  0x22   :  { %s2238_s28 = scalar_lea.hbm %s2997_s3, 16 }
  0x23   :  { %p2239_p8 = scmp.ne.s32.totalorder %s2997_s3, %s2238_s28  ;;  %p2242_p9 = scmp.lt.u32.totalorder %s2238_s28, %s2997_s3 }
  0x25   :  { %p2244_p10 = pnand %p2242_p9, %p2239_p8 }
  0x27   :  { %2247 = shalt.err (!%p2244_p10)
}
  0x28   :  { %s2248_s5 = scalar_lea.vmem %s45_s27, 16  ;;  %s2252_s22 = scalar_lea.vmem %s45_s27, 32 }
  0x29   :  { %p2249_p11 = scmp.ne.s32.totalorder %s45_s27, %s2248_s5  ;;  %p2253_p12 = scmp.lt.s32.totalorder %s45_s27, %s45_s27 }
  0x2a   :  { %p2254_p13 = scmp.lt.s32.totalorder %s2252_s22, %s2248_s5 }
  0x2c   :  { %p2255_p0 = por %p2254_p13, %p2253_p12 }
  0x2e   :  { %p2256_p1 = pnand %p2255_p0, %p2249_p11 }
  0x30   :  { %2259 = shalt.err (!%p2256_p1)
}
  0x31   :  { %47 = dma.hbm_to_vmem [thread:$0]  %s2997_s3, 16, %s45_s27, [#allocation3]  }
  0x32   :  { %s2336_s23 = smov [#allocation7]   ;;  %s2337_s24 = smov [#allocation8]  }
  0x33   :  { %s68_s1 = sshll.u32 %s2336_s23, 4  ;;  %s89_s2 = sshll.u32 %s2337_s24, 4  ;;  %s69_s1 = int_to_ptr.vmem [resolvable:$true] %s68_s1  ;;  %s2475_s2 = int_to_ptr.vmem [resolvable:$true] %s89_s2 }
  0x34   :  { %s2260_s0 = scalar_lea.hbm %s2973_s8, 16 }
  0x35   :  { %p2261_p2 = scmp.ne.s32.totalorder %s2973_s8, %s2260_s0  ;;  %p2264_p3 = scmp.lt.u32.totalorder %s2260_s0, %s2973_s8 }
  0x37   :  { %p2266_p4 = pnand %p2264_p3, %p2261_p2 }
  0x39   :  { %2269 = shalt.err (!%p2266_p4)
}
  0x3a   :  { %s2270_s27 = scalar_lea.vmem %s69_s1, 16  ;;  %s2274_s3 = scalar_lea.vmem %s69_s1, 32 }
  0x3b   :  { %p2271_p5 = scmp.ne.s32.totalorder %s69_s1, %s2270_s27  ;;  %p2275_p6 = scmp.lt.s32.totalorder %s69_s1, %s69_s1 }
  0x3c   :  { %p2276_p7 = scmp.lt.s32.totalorder %s2274_s3, %s2270_s27 }
  0x3e   :  { %p2277_p8 = por %p2276_p7, %p2275_p6 }
  0x40   :  { %p2278_p9 = pnand %p2277_p8, %p2271_p5 }
  0x42   :  { %2281 = shalt.err (!%p2278_p9)
}
  0x43   :  { %71 = dma.hbm_to_vmem [thread:$0]  %s2973_s8, 16, %s69_s1, [#allocation6]  }
  0x44   :  { %s2282_s24 = scalar_lea.hbm %s2980_s15, 512 }
  0x45   :  { %p2283_p10 = scmp.ne.s32.totalorder %s2980_s15, %s2282_s24  ;;  %p2286_p11 = scmp.lt.u32.totalorder %s2282_s24, %s2980_s15 }
  0x47   :  { %p2288_p12 = pnand %p2286_p11, %p2283_p10 }
  0x49   :  { %2291 = shalt.err (!%p2288_p12)
}
  0x4a   :  { %s2292_s4 = scalar_lea.vmem %s2475_s2, 512  ;;  %p2297_p0 = scmp.lt.s32.totalorder %s2475_s2, %s2475_s2 }
  0x4b   :  { %p2293_p13 = scmp.ne.s32.totalorder %s2475_s2, %s2292_s4  ;;  %p2298_p1 = scmp.lt.s32.totalorder %s2292_s4, %s2292_s4 }
  0x4d   :  { %p2299_p2 = por %p2298_p1, %p2297_p0 }
  0x4f   :  { %p2300_p3 = pnand %p2299_p2, %p2293_p13 }
  0x51   :  { %2303 = shalt.err (!%p2300_p3)
}
  0x52   :  { %s2338_s8 = smov 128   ;;  %s2339_s1 = smov 8  }
  0x53   :  { %95 = dma.hbm_to_vmem [thread:$0]  %s2980_s15, 512, %s2475_s2, [#allocation9], %s2338_s8, %s2338_s8, %s2339_s1  }
  0x54   :  { %2326 = dma.done.wait [#allocation3], 16  }
  0x55   :  { %2327 = vsyncadd [#allocation3], 4294967280 }
  0x56   :  { %2328 = dma.done.wait [#allocation6], 32  }
  0x57   :  { %2329 = vsyncadd [#allocation6], 4294967264 }
  0x58   :  { %2330 = dma.done.wait [#allocation9], 512  }
  0x59   :  { %2331 = vsyncadd [#allocation9], 4294966784  ;;  %vm122_vm0 = vcmask 261120   ;;  %s2998_s22 = sld [smem:[#allocation15_spill]]  ;;  %s2999_s0 = sld [smem:[#allocation18_spill]]  ;;  %vm756_vm2 = vcmask 523264  }
  0x5a   :  { %s3000_s25 = sld [smem:[#allocation20_spill]]  ;;  %s3001_s26 = sld [smem:[#allocation16_spill]]  ;;  %vm2667_vm1 = vmpackc.low %vm122_vm0, %vm122_vm0 }
  0x5b   :  { %s3002_s29 = sld [smem:[#allocation17_spill]] }
  0x5f   :  { %v2512_v0 = vld [vmem:[%s2998_s22 + $0x18] sm:$0xff]  ;;  %v2517_v1 = vld [vmem:[%s2998_s22] sm:$0xff]  ;;  %v2522_v2 = vld [vmem:[%s2998_s22 + $0x8] sm:$0xff] }
  0x60   :  { %v132_v3 = vsel %vm122_vm0, %v2512_v0, 0.0  ;;  %v123_v4 = vsel %vm122_vm0, %v2517_v1, 0.0  ;;  %v140_v5 = vmul.f32 %v2517_v1, %v2517_v1  ;;  %v126_v7 = vsel %vm122_vm0, %v2522_v2, 0.0  ;;  %v2538_v9 = vld [vmem:[%s2998_s22 + $0x10] sm:$0xff]  ;;  %v206_v16 = vld [vmem:[%s2999_s0] sm:$0xff]  ;;  %v207_v17 = vld [vmem:[%s2999_s0 + $0x8] sm:$0xff] }
  0x61   :  { %133 = vadd.xlane.f32.xlu1 %v132_v3  ;;  %124 = vadd.xlane.f32.xlu0 %v123_v4  ;;  %v141_v8 = vmul.f32 %v2522_v2, %v2522_v2  ;;  %v129_v11 = vsel %vm122_vm0, %v2538_v9, 0.0  ;;  %v143_v12 = vmul.f32 %v2512_v0, %v2512_v0  ;;  %v142_v13 = vmul.f32 %v2538_v9, %v2538_v9  ;;  %v208_v18 = vld [vmem:[%s2999_s0 + $0x10] sm:$0xff]  ;;  %v209_v20 = vld [vmem:[%s2999_s0 + $0x18] sm:$0xff]  ;;  %v314_v22 = vld [vmem:[%s3000_s25] sm:$0xff] }
  0x62   :  { %v144_v6 = vsel %vm122_vm0, %v140_v5, 0.0  ;;  %v1993_v19 = vpack.c.bf16 %v207_v17, %v206_v16  ;;  %v1997_v21 = vpack.c.bf16 %v209_v20, %v208_v18  ;;  %v315_v23 = vld [vmem:[%s3000_s25 + $0x8] sm:$0xff]  ;;  %v1615_v55 = vld [vmem:[%s3001_s26] ss:$0 sm:$0xff]  ;;  %v316_v63 = vld [vmem:[%s3000_s25 + $0x10] sm:$0xff] }
  0x63   :  { %v147_v10 = vsel %vm122_vm0, %v141_v8, 0.0  ;;  %v153_v14 = vsel %vm122_vm0, %v143_v12, 0.0  ;;  %v150_v15 = vsel %vm122_vm0, %v142_v13, 0.0  ;;  %v2001_v24 = vpack.c.bf16 %v315_v23, %v314_v22  ;;  %v1616_v57 = vld [vmem:[%s3002_s29] ss:$0 sm:$0xff]  ;;  %v317_v3 = vld [vmem:[%s3000_s25 + $0x18] sm:$0xff] }
  0x64   :  { %1994 = vmatprep.subr.bf16.mxu0 %v1993_v19  ;;  %v413_v22 = vld [vmem:[%s2972_s7 + $0x18] sm:$0xff] }
  0x65   :  { %145 = vadd.xlane.f32.xlu1 %v144_v6  ;;  %127 = vadd.xlane.f32.xlu0 %v126_v7 }
  0x66   :  { %1996 = vmatpush3.bf16.msra.mxu0 %v1993_v19 }
  0x67   :  { %1998 = vmatprep.subr.bf16.mxu0 %v1997_v21 }
  0x69   :  { %148 = vadd.xlane.f32.xlu1 %v147_v10  ;;  %130 = vadd.xlane.f32.xlu0 %v129_v11  ;;  %v2005_v11 = vpack.c.bf16 %v317_v3, %v316_v63 }
  0x6a   :  { %2000 = vmatpush3.bf16.msra.mxu0 %v1997_v21  ;;  %v412_v21 = vld [vmem:[%s2972_s7 + $0x10] sm:$0xff] }
  0x6b   :  { %2002 = vmatprep.subr.bf16.mxu0 %v2001_v24  ;;  %v2013_v23 = vpack.c.bf16 %v413_v22, %v412_v21 }
  0x6d   :  { %154 = vadd.xlane.f32.xlu1 %v153_v14  ;;  %151 = vadd.xlane.f32.xlu0 %v150_v15  ;;  %v410_v14 = vld [vmem:[%s2972_s7] sm:$0xff]  ;;  %v411_v15 = vld [vmem:[%s2972_s7 + $0x8] sm:$0xff] }
  0x6e   :  { %v2009_v19 = vpack.c.bf16 %v411_v15, %v410_v14 }
  0xee   :  { %v134_v25 = vpop.xlane.xlu1 %133  ;;  %v125_v26 = vpop.xlane.xlu0 %124 }
  0xef   :  { %v136_v27 = vmul.f32 0.03125, %v125_v26  ;;  %v139_v34 = vmul.f32 0.03125, %v134_v25 }
  0xf1   :  { %v160_v30 = vmul.f32 %v136_v27, %v136_v27  ;;  %v163_v42 = vmul.f32 %v139_v34, %v139_v34  ;;  %v168_v53 = vsub.f32 %v2517_v1, %v136_v27  ;;  %v171_v4 = vsub.f32 %v2512_v0, %v139_v34  ;;  %v2624_v34 = vld [vmem:[%s2974_s9 + $0x28] sm:$0xff] }
  0xf2   :  { %v146_v28 = vpop.xlane.xlu1 %145  ;;  %v128_v29 = vpop.xlane.xlu0 %127 }
  0xf3   :  { %v156_v31 = vmul.f32 0.03125, %v146_v28  ;;  %v137_v32 = vmul.f32 0.03125, %v128_v29 }
  0xf5   :  { %v164_v33 = vsub.f32 %v156_v31, %v160_v30  ;;  %v161_v38 = vmul.f32 %v137_v32, %v137_v32  ;;  %v169_v58 = vsub.f32 %v2522_v2, %v137_v32  ;;  %v1622_v31 = vld [vmem:[#allocation5] ss:$0 sm:$0xff] }
  0xf6   :  { %v149_v35 = vpop.xlane.xlu1 %148  ;;  %v131_v36 = vpop.xlane.xlu0 %130 }
  0xf7   :  { %v172_v37 = vadd.f32 1e-06, %v164_v33  ;;  %v157_v39 = vmul.f32 0.03125, %v149_v35  ;;  %v138_v40 = vmul.f32 0.03125, %v131_v36  ;;  %v2619_v33 = vld [vmem:[%s2974_s9 + $0x18] sm:$0xff]  ;;  %v2630_v35 = vld [vmem:[%s2974_s9 + $0x8] sm:$0xff] }
  0xf9   :  { %2168 = vrsqrt.f32 %v172_v37  ;;  %v165_v41 = vsub.f32 %v157_v39, %v161_v38  ;;  %v162_v46 = vmul.f32 %v138_v40, %v138_v40  ;;  %v170_v7 = vsub.f32 %v2538_v9, %v138_v40  ;;  %v2635_v38 = vld [vmem:[%s2974_s9 + $0x10] sm:$0xff]  ;;  %v2640_v39 = vld [vmem:[%s2974_s9 + $0x20] sm:$0xff] }
  0xfa   :  { %v155_v43 = vpop.xlane.xlu1 %154  ;;  %v152_v44 = vpop.xlane.xlu0 %151  ;;  %v2645_v40 = vld [vmem:[%s2974_s9] sm:$0xff] }
  0xfb   :  { %v173_v45 = vadd.f32 1e-06, %v165_v41  ;;  %v159_v47 = vmul.f32 0.03125, %v155_v43  ;;  %v158_v48 = vmul.f32 0.03125, %v152_v44  ;;  %v2650_v41 = vld [vmem:[%s2974_s9 + $0x38] sm:$0xff]  ;;  %v2655_v43 = vld [vmem:[%s2974_s9 + $0x30] sm:$0xff] }
  0xfd   :  { %2170 = vrsqrt.f32 %v173_v45  ;;  %v167_v49 = vsub.f32 %v159_v47, %v163_v42  ;;  %v166_v50 = vsub.f32 %v158_v48, %v162_v46 }
  0xff   :  { %v175_v51 = vadd.f32 1e-06, %v167_v49  ;;  %v174_v52 = vadd.f32 1e-06, %v166_v50 }
 0x101   :  { %2172 = vrsqrt.f32 %v175_v51 }
 0x102   :  { %2174 = vrsqrt.f32 %v174_v52 }
 0x103   :  { %v2169_v54 = vpop.eup %2168 }
 0x104   :  { %v180_v56 = vmul.f32 %v2169_v54, %v168_v53 }
 0x106   :  { %v191_v59 = vmul.f32 %v1615_v55, %v180_v56 }
 0x107   :  { %v2171_v60 = vpop.eup %2170 }
 0x108   :  { %v202_v61 = vadd.f32 %v1616_v57, %v191_v59  ;;  %v181_v62 = vmul.f32 %v2171_v60, %v169_v58 }
 0x10a   :  { %1795 = vmatprep.mubr.msk.f32.mxu0 %vm122_vm0, %v202_v61  ;;  %v192_v5 = vmul.f32 %v1615_v55, %v181_v62 }
 0x10b   :  { %v2173_v6 = vpop.eup %2172 }
 0x10c   :  { %v2175_v8 = vpop.eup %2174  ;;  %v203_v10 = vadd.f32 %v1616_v57, %v192_v5  ;;  %v183_v12 = vmul.f32 %v2173_v6, %v171_v4 }
 0x10d   :  { %v182_v13 = vmul.f32 %v2175_v8, %v170_v7 }
 0x10e   :  { %1796 = vmatmul.mubr.msk.f32.vlgmr.msra.gmra.mrb[0].mxu0 %vm122_vm0, %v203_v10  ;;  %v194_v16 = vmul.f32 %v1615_v55, %v183_v12 }
 0x10f   :  { %2004 = vmatpush3.bf16.msra.mxu0 %v2001_v24  ;;  %v193_v17 = vmul.f32 %v1615_v55, %v182_v13  ;;  %v2607_v24 = vld [vmem:[#allocation2] ss:$0 sm:$0xff] }
 0x110   :  { %2006 = vmatprep.subr.bf16.mxu0 %v2005_v11  ;;  %v205_v18 = vadd.f32 %v1616_v57, %v194_v16 }
 0x111   :  { %v204_v20 = vadd.f32 %v1616_v57, %v193_v17  ;;  %v1627_v57 = vld [vmem:[#allocation7] ss:$0 sm:$0xff] }
 0x113   :  { %1798 = vmatprep.mubr.msk.f32.mxu0 %vm122_vm0, %v204_v20  ;;  %2008 = vmatpush3.bf16.msra.mxu0 %v2005_v11 }
 0x114   :  { %1799 = vmatmul.mubr.msk.f32.gmra.mrb[2].mxu0 %vm122_vm0, %v205_v18  ;;  %2010 = vmatprep.subr.bf16.mxu0 %v2009_v19 }
 0x115   :  { %1809 = vmatprep.mubr.msk.f32.mxu0 %vm122_vm0, %v202_v61 }
 0x118   :  { %1810 = vmatmul.mubr.msk.f32.vlgmr.msra.gmra.mrb[4].mxu0 %vm122_vm0, %v203_v10 }
 0x119   :  { %1812 = vmatprep.mubr.msk.f32.mxu0 %vm122_vm0, %v204_v20  ;;  %2012 = vmatpush3.bf16.msra.mxu0 %v2009_v19 }
 0x11a   :  { %2014 = vmatprep.subr.bf16.mxu0 %v2013_v23 }
 0x11c   :  { %1813 = vmatmul.mubr.msk.f32.gmra.mrb[6].mxu0 %vm122_vm0, %v205_v18 }
 0x11d   :  { %2016 = vmatpush3.bf16.msra.mxu0 %v2013_v23  ;;  %1823 = vmatprep.mubr.msk.f32.mxu0 %vm122_vm0, %v202_v61 }
 0x120   :  { %1824 = vmatmul.mubr.msk.f32.vlgmr.msra.gmra.mrb[8].mxu0 %vm122_vm0, %v203_v10 }
 0x121   :  { %1826 = vmatprep.mubr.msk.f32.mxu0 %vm122_vm0, %v204_v20 }
 0x124   :  { %1827 = vmatmul.mubr.msk.f32.gmra.mrb[10].mxu0 %vm122_vm0, %v205_v18 }
 0x1e1   :  { %v2609_v25 = vpop.f32.mrb[0].mxu0 }
 0x1e2   :  { %v295_v26 = vpop.f32.mrb[1].mxu0 }
 0x1e3   :  { %v296_v27 = vadd.f32 %v2607_v24, %v295_v26 }
 0x1e5   :  { %1845 = vmatprep.mubr.msk.f32.mxu1 %vm122_vm0, %v296_v27 }
 0x1e7   :  { %v2613_v28 = vpop.f32.mrb[2].mxu0 }
 0x1e8   :  { %v305_v29 = vpop.f32.mrb[3].mxu0  ;;  %v311_v55 = vadd.f32 %v2613_v28, %v2607_v24 }
 0x1e9   :  { %v306_v30 = vadd.f32 %v2607_v24, %v305_v29 }
 0x1eb   :  { %v1811_v32 = vpop.f32.mrb[4].mxu0  ;;  %1864 = vmatprep.mubr.msk.f32.mxu0 %vm122_vm0, %v306_v30 }
 0x1ec   :  { %v397_v36 = vadd.f32 %v1811_v32, %v1622_v31  ;;  %v391_v37 = vpop.f32.mrb[5].mxu0 }
 0x1ed   :  { %v392_v42 = vadd.f32 %v1622_v31, %v391_v37 }
 0x1ee   :  { %v517_v44 = vmul.f32 %v2619_v33, %v397_v36  ;;  %v519_v45 = vmul.f32 %v2624_v34, %v397_v36  ;;  %v515_v46 = vmul.f32 %v2630_v35, %v397_v36  ;;  %v521_v51 = vmul.f32 %v2650_v41, %v397_v36 }
 0x1ef   :  { %v516_v47 = vmul.f32 %v2635_v38, %v392_v42  ;;  %v518_v48 = vmul.f32 %v2640_v39, %v392_v42  ;;  %v1814_v49 = vpop.f32.mrb[6].mxu0  ;;  %v514_v50 = vmul.f32 %v2645_v40, %v392_v42  ;;  %v520_v52 = vmul.f32 %v2655_v43, %v392_v42 }
 0x1f0   :  { %v407_v53 = vadd.f32 %v1814_v49, %v1622_v31  ;;  %v401_v54 = vpop.f32.mrb[7].mxu0 }
 0x1f1   :  { %v402_v56 = vadd.f32 %v1622_v31, %v401_v54  ;;  %v2017_v58 = vpack.c.bf16 %v515_v46, %v514_v50  ;;  %v2023_v59 = vpack.c.bf16 %v517_v44, %v516_v47  ;;  %v2029_v60 = vpack.c.bf16 %v519_v45, %v518_v48 }
 0x1f2   :  { %v525_v61 = vmul.f32 %v2619_v33, %v407_v53  ;;  %v527_v62 = vmul.f32 %v2624_v34, %v407_v53  ;;  %v529_v63 = vmul.f32 %v2650_v41, %v407_v53  ;;  %v523_v3 = vmul.f32 %v2630_v35, %v407_v53  ;;  %v784_v53 = vld [vmem:[%s2975_s10 + $0x18] sm:$0xff] }
 0x1f3   :  { %v524_v4 = vmul.f32 %v2635_v38, %v402_v56  ;;  %v526_v5 = vmul.f32 %v2640_v39, %v402_v56  ;;  %v528_v6 = vmul.f32 %v2655_v43, %v402_v56  ;;  %v1825_v7 = vpop.f32.mrb[8].mxu0  ;;  %2019 = vmatprep.subr.msk.bf16.mxu1 %vm2667_vm1, %v2017_v58  ;;  %v522_v8 = vmul.f32 %v2645_v40, %v402_v56 }
 0x1f4   :  { %v493_v10 = vadd.f32 %v1825_v7, %v1627_v57  ;;  %v487_v11 = vpop.f32.mrb[9].mxu0  ;;  %2022 = vmatpush3.bf16.xpose.msk.msra.mxu1 %vm2667_vm1, %v2017_v58  ;;  %v2035_v12 = vpack.c.bf16 %v521_v51, %v520_v52  ;;  %v301_v54 = vadd.f32 %v2609_v25, %v2607_v24  ;;  %v786_v58 = vld [vmem:[%s2975_s10 + $0x28] sm:$0xff]  ;;  %v787_v25 = vld [vmem:[%s2975_s10 + $0x30] sm:$0xff] }
 0x1f5   :  { %v488_v13 = vadd.f32 %v1627_v57, %v487_v11  ;;  %2025 = vmatprep.subr.msk.bf16.mxu1 %vm2667_vm1, %v2023_v59  ;;  %v2041_v14 = vpack.c.bf16 %v523_v3, %v522_v8  ;;  %v2047_v15 = vpack.c.bf16 %v525_v61, %v524_v4  ;;  %v2053_v16 = vpack.c.bf16 %v527_v62, %v526_v5 }
 0x1f6   :  { %v2059_v17 = vpack.c.bf16 %v529_v63, %v528_v6  ;;  %v531_v18 = vmul.f32 %v2630_v35, %v493_v10  ;;  %v533_v19 = vmul.f32 %v2619_v33, %v493_v10  ;;  %v535_v20 = vmul.f32 %v2624_v34, %v493_v10 }
 0x1f7   :  { %v1828_v21 = vpop.f32.mrb[10].mxu0  ;;  %2043 = vmatprep.subr.msk.bf16.mxu0 %vm2667_vm1, %v2041_v14  ;;  %v530_v22 = vmul.f32 %v2645_v40, %v488_v13  ;;  %v532_v23 = vmul.f32 %v2635_v38, %v488_v13  ;;  %v534_v26 = vmul.f32 %v2640_v39, %v488_v13  ;;  %v536_v27 = vmul.f32 %v2655_v43, %v488_v13 }
 0x1f8   :  { %v503_v29 = vadd.f32 %v1828_v21, %v1627_v57  ;;  %v497_v30 = vpop.f32.mrb[11].mxu0  ;;  %2046 = vmatpush3.bf16.xpose.msk.msra.mxu0 %vm2667_vm1, %v2041_v14  ;;  %v537_v31 = vmul.f32 %v2650_v41, %v493_v10 }
 0x1f9   :  { %v498_v32 = vadd.f32 %v1627_v57, %v497_v30  ;;  %2049 = vmatprep.subr.msk.bf16.mxu0 %vm2667_vm1, %v2047_v15  ;;  %v2081_v36 = vpack.c.bf16 %v531_v18, %v530_v22  ;;  %v2085_v37 = vpack.c.bf16 %v533_v19, %v532_v23  ;;  %v2089_v42 = vpack.c.bf16 %v535_v20, %v534_v26  ;;  %v785_v57 = vld [vmem:[%s2975_s10 + $0x20] sm:$0xff] }
 0x1fa   :  { %v2093_v44 = vpack.c.bf16 %v537_v31, %v536_v27  ;;  %v539_v45 = vmul.f32 %v2630_v35, %v503_v29  ;;  %v541_v46 = vmul.f32 %v2619_v33, %v503_v29  ;;  %v543_v47 = vmul.f32 %v2624_v34, %v503_v29  ;;  %v1060_v26 = vld [vmem:[%s2976_s11] sm:$0xff]  ;;  %v1061_v27 = vld [vmem:[%s2976_s11 + $0x8] sm:$0xff] }
 0x1fb   :  { %v538_v48 = vmul.f32 %v2645_v40, %v498_v32  ;;  %v540_v49 = vmul.f32 %v2635_v38, %v498_v32  ;;  %v542_v50 = vmul.f32 %v2640_v39, %v498_v32  ;;  %v544_v51 = vmul.f32 %v2655_v43, %v498_v32  ;;  %v781_v38 = vld [vmem:[%s2975_s10] sm:$0xff]  ;;  %v782_v39 = vld [vmem:[%s2975_s10 + $0x8] sm:$0xff]  ;;  %v783_v43 = vld [vmem:[%s2975_s10 + $0x10] sm:$0xff] }
 0x1fc   :  { %2028 = vmatpush3.bf16.xpose.msk.msra.mxu1 %vm2667_vm1, %v2023_v59  ;;  %v545_v52 = vmul.f32 %v2650_v41, %v503_v29  ;;  %v2065_v41 = vpack.c.bf16 %v782_v39, %v781_v38  ;;  %v2069_v56 = vpack.c.bf16 %v784_v53, %v783_v43  ;;  %v2073_v59 = vpack.c.bf16 %v786_v58, %v785_v57  ;;  %v1660_v53 = vld [vmem:[%s2977_s12] ss:$0 sm:$0xff] }
 0x1fd   :  { %2031 = vmatprep.subr.msk.bf16.mxu1 %vm2667_vm1, %v2029_v60  ;;  %v2711_v35 = vpack.c.bf16 %v539_v45, %v538_v48  ;;  %v2713_v33 = vpack.c.bf16 %v541_v46, %v540_v49  ;;  %v2715_v34 = vpack.c.bf16 %v543_v47, %v542_v50  ;;  %v2113_v29 = vpack.c.bf16 %v1061_v27, %v1060_v26  ;;  %v1062_v47 = vld [vmem:[%s2976_s11 + $0x10] sm:$0xff]  ;;  %v1063_v48 = vld [vmem:[%s2976_s11 + $0x18] sm:$0xff] }
 0x1fe   :  { %v2717_v40 = vpack.c.bf16 %v545_v52, %v544_v51  ;;  %v2117_v52 = vpack.c.bf16 %v1063_v48, %v1062_v47 }
 0x200   :  { %2052 = vmatpush3.bf16.xpose.msk.msra.mxu0 %vm2667_vm1, %v2047_v15 }
 0x201   :  { %2055 = vmatprep.subr.msk.bf16.mxu0 %vm2667_vm1, %v2053_v16 }
 0x204   :  { %2034 = vmatpush3.bf16.xpose.msk.msra.mxu1 %vm2667_vm1, %v2029_v60  ;;  %v788_v60 = vld [vmem:[%s2975_s10 + $0x38] sm:$0xff] }
 0x205   :  { %2037 = vmatprep.subr.msk.bf16.mxu1 %vm2667_vm1, %v2035_v12  ;;  %v2077_v61 = vpack.c.bf16 %v788_v60, %v787_v25 }
 0x208   :  { %2058 = vmatpush3.bf16.xpose.msk.msra.mxu0 %vm2667_vm1, %v2053_v16 }
 0x209   :  { %2061 = vmatprep.subr.msk.bf16.mxu0 %vm2667_vm1, %v2059_v17 }
 0x20c   :  { %2040 = vmatpush3.bf16.xpose.msk.msra.mxu1 %vm2667_vm1, %v2035_v12 }
 0x20d   :  { %2066 = vmatprep.subr.bf16.mxu1 %v2065_v41 }
 0x210   :  { %2064 = vmatpush3.bf16.xpose.msk.msra.mxu0 %vm2667_vm1, %v2059_v17 }
 0x211   :  { %2082 = vmatprep.subr.bf16.mxu0 %v2081_v36 }
 0x213   :  { %1846 = vmatmul.mubr.msk.f32.vlgmr.msra.gmra.mrb[0].mxu1 %vm122_vm0, %v301_v54 }
 0x214   :  { %2068 = vmatpush3.bf16.msra.mxu1 %v2065_v41 }
 0x215   :  { %2070 = vmatprep.subr.bf16.mxu1 %v2069_v56 }
 0x217   :  { %1865 = vmatmul.mubr.msk.f32.vlgmr.msra.gmra.mrb[12].mxu0 %vm122_vm0, %v311_v55 }
 0x218   :  { %2072 = vmatpush3.bf16.msra.mxu1 %v2069_v56  ;;  %2084 = vmatpush3.bf16.msra.mxu0 %v2081_v36 }
 0x219   :  { %2086 = vmatprep.subr.bf16.mxu0 %v2085_v37  ;;  %2074 = vmatprep.subr.bf16.mxu1 %v2073_v59 }
 0x21c   :  { %2076 = vmatpush3.bf16.msra.mxu1 %v2073_v59  ;;  %2088 = vmatpush3.bf16.msra.mxu0 %v2085_v37 }
 0x21d   :  { %2090 = vmatprep.subr.bf16.mxu0 %v2089_v42  ;;  %2078 = vmatprep.subr.bf16.mxu1 %v2077_v61 }
 0x220   :  { %2080 = vmatpush3.bf16.msra.mxu1 %v2077_v61  ;;  %2092 = vmatpush3.bf16.msra.mxu0 %v2089_v42 }
 0x221   :  { %2094 = vmatprep.subr.bf16.mxu0 %v2093_v44  ;;  %2098 = vmatprep.subr.bf16.mxu1 %v2711_v35 }
 0x224   :  { %2096 = vmatpush3.bf16.msra.mxu0 %v2093_v44 }
 0x225   :  { %2114 = vmatprep.subr.bf16.mxu0 %v2113_v29 }
 0x2e6   :  { %v1847_v24 = vpop.f32.mrb[0].mxu1 }
 0x2e7   :  { %v642_v28 = vpop.f32.mrb[1].mxu1  ;;  %v760_v62 = vsel %vm756_vm2, %v1847_v24, -inf }
 0x2e8   :  { %761 = vmax.xlane.f32.xlu1 %v760_v62  ;;  %v757_v63 = vsel %vm756_vm2, %v642_v28, -inf }
 0x2e9   :  { %758 = vmax.xlane.f32.xlu0 %v757_v63 }
 0x2ea   :  { %v1866_v3 = vpop.f32.mrb[12].mxu0 }
 0x2eb   :  { %v747_v4 = vpop.f32.mrb[13].mxu0  ;;  %v766_v5 = vsel %vm756_vm2, %v1866_v3, -inf }
 0x2ec   :  { %767 = vmax.xlane.f32.xlu1 %v766_v5  ;;  %v763_v6 = vsel %vm756_vm2, %v747_v4, -inf }
 0x2ed   :  { %764 = vmax.xlane.f32.xlu0 %v763_v6 }
 0x375   :  { %v762_v7 = vpop.xlane.xlu1 %761 }
 0x376   :  { %v770_v8 = vsub.f32 %v1847_v24, %v762_v7  ;;  %v759_v10 = vpop.xlane.xlu0 %758 }
 0x377   :  { %v769_v11 = vsub.f32 %v642_v28, %v759_v10 }
 0x378   :  { %v775_v12 = vmul.f32 1.442695, %v770_v8 }
 0x379   :  { %v773_v13 = vmul.f32 1.442695, %v769_v11  ;;  %v768_v14 = vpop.xlane.xlu1 %767  ;;  %v1254_v11 = vld [vmem:[#allocation8] sm:$0xff] }
 0x37a   :  { %v772_v15 = vsub.f32 %v1866_v3, %v768_v14  ;;  %v765_v16 = vpop.xlane.xlu0 %764 }
 0x37b   :  { %2176 = vpow2.f32 %v773_v13  ;;  %v771_v17 = vsub.f32 %v747_v4, %v765_v16  ;;  %v1256_v13 = vld [vmem:[#allocation8 + $0x10] sm:$0xff] }
 0x37c   :  { %2178 = vpow2.f32 %v775_v12  ;;  %v779_v18 = vmul.f32 1.442695, %v772_v15  ;;  %v1255_v12 = vld [vmem:[#allocation8 + $0x8] sm:$0xff]  ;;  %v1257_v15 = vld [vmem:[#allocation8 + $0x18] sm:$0xff] }
 0x37d   :  { %v777_v19 = vmul.f32 1.442695, %v771_v17  ;;  %v2121_v14 = vpack.c.bf16 %v1255_v12, %v1254_v11  ;;  %v2125_v16 = vpack.c.bf16 %v1257_v15, %v1256_v13  ;;  %v1401_v11 = vld [vmem:[%s2982_s17 + $0x18] sm:$0xff]  ;;  %v1402_v13 = vld [vmem:[%s2982_s17 + $0x20] sm:$0xff] }
 0x37f   :  { %2180 = vpow2.f32 %v777_v19 }
 0x380   :  { %2182 = vpow2.f32 %v779_v18 }
 0x385   :  { %v2177_v20 = vpop.eup %2176 }
 0x386   :  { %v2179_v21 = vpop.eup %2178  ;;  %1883 = vmatprep.mubr.msk.f32.mxu1 %vm756_vm2, %v2177_v20 }
 0x387   :  { %1884 = vmatmul.mubr.msk.f32.vlgmr.msra.gmra.mrb[2].mxu1 %vm756_vm2, %v2179_v21 }
 0x388   :  { %2100 = vmatpush3.bf16.msra.mxu1 %v2711_v35 }
 0x389   :  { %v2181_v22 = vpop.eup %2180  ;;  %2102 = vmatprep.subr.bf16.mxu1 %v2713_v33 }
 0x38a   :  { %v2183_v23 = vpop.eup %2182  ;;  %1886 = vmatprep.mubr.msk.f32.mxu1 %vm756_vm2, %v2181_v22 }
 0x38b   :  { %1887 = vmatmul.mubr.msk.f32.gmra.mrb[4].mxu1 %vm756_vm2, %v2183_v23 }
 0x38c   :  { %2104 = vmatpush3.bf16.msra.mxu1 %v2713_v33 }
 0x38d   :  { %2106 = vmatprep.subr.bf16.mxu1 %v2715_v34 }
 0x390   :  { %2108 = vmatpush3.bf16.msra.mxu1 %v2715_v34 }
 0x391   :  { %2110 = vmatprep.subr.bf16.mxu1 %v2717_v40 }
 0x394   :  { %2112 = vmatpush3.bf16.msra.mxu1 %v2717_v40 }
 0x45a   :  { %v1885_v30 = vpop.f32.mrb[2].mxu1 }
 0x45b   :  { %v887_v31 = vmax.f32 %v1885_v30, 1e-30  ;;  %v867_v32 = vpop.f32.mrb[3].mxu1 }
 0x45c   :  { %v886_v36 = vmax.f32 %v867_v32, 1e-30 }
 0x45d   :  { %2184 = vrcp.f32 %v887_v31 }
 0x45e   :  { %2186 = vrcp.f32 %v886_v36  ;;  %v1888_v37 = vpop.f32.mrb[4].mxu1 }
 0x45f   :  { %v889_v42 = vmax.f32 %v1888_v37, 1e-30  ;;  %v877_v44 = vpop.f32.mrb[5].mxu1 }
 0x460   :  { %v888_v45 = vmax.f32 %v877_v44, 1e-30 }
 0x461   :  { %2188 = vrcp.f32 %v889_v42 }
 0x462   :  { %2190 = vrcp.f32 %v888_v45 }
 0x467   :  { %v2185_v46 = vpop.eup %2184 }
 0x468   :  { %v2187_v49 = vpop.eup %2186  ;;  %v895_v51 = vmul.f32 %v2185_v46, %v2179_v21 }
 0x469   :  { %v894_v50 = vmul.f32 %v2187_v49, %v2177_v20 }
 0x46b   :  { %v2189_v35 = vpop.eup %2188  ;;  %1905 = vmatprep.mubr.msk.f32.mxu0 %vm756_vm2, %v894_v50 }
 0x46c   :  { %v2191_v33 = vpop.eup %2190  ;;  %1906 = vmatmul.mubr.msk.f32.vlgmr.msra.gmra.mrb[14].mxu0 %vm756_vm2, %v895_v51  ;;  %v897_v40 = vmul.f32 %v2189_v35, %v2183_v23 }
 0x46d   :  { %v896_v34 = vmul.f32 %v2191_v33, %v2181_v22  ;;  %2116 = vmatpush3.bf16.msra.mxu0 %v2113_v29 }
 0x46e   :  { %2118 = vmatprep.subr.bf16.mxu0 %v2117_v52 }
 0x46f   :  { %1924 = vmatprep.mubr.msk.f32.mxu1 %vm756_vm2, %v896_v34 }
 0x470   :  { %1925 = vmatmul.mubr.msk.f32.vlgmr.msra.gmra.mrb[6].mxu1 %vm756_vm2, %v897_v40 }
 0x471   :  { %2120 = vmatpush3.bf16.msra.mxu0 %v2117_v52 }
 0x472   :  { %2122 = vmatprep.subr.bf16.mxu0 %v2121_v14 }
 0x53f   :  { %v1907_v38 = vpop.f32.mrb[14].mxu0 }
 0x540   :  { %v970_v39 = vpop.f32.mrb[15].mxu0 }
 0x541   :  { %1935 = vmatprep.mubr.msk.f32.mxu0 %vm122_vm0, %v970_v39 }
 0x542   :  { %1936 = vmatmul.mubr.msk.f32.vlgmr.msra.gmra.mrb[16].mxu0 %vm122_vm0, %v1907_v38 }
 0x543   :  { %v1926_v41 = vpop.f32.mrb[6].mxu1  ;;  %2124 = vmatpush3.bf16.msra.mxu0 %v2121_v14  ;;  %v1403_v14 = vld [vmem:[%s2982_s17 + $0x28] sm:$0xff] }
 0x544   :  { %v1051_v43 = vpop.f32.mrb[7].mxu1  ;;  %2126 = vmatprep.subr.bf16.mxu0 %v2125_v16  ;;  %v2137_v15 = vpack.c.bf16 %v1403_v14, %v1402_v13 }
 0x545   :  { %1938 = vmatprep.mubr.msk.f32.mxu0 %vm122_vm0, %v1051_v43 }
 0x546   :  { %1939 = vmatmul.mubr.msk.f32.gmra.mrb[18].mxu0 %vm122_vm0, %v1926_v41  ;;  %v1665_v41 = vld [vmem:[%s2978_s13] ss:$0 sm:$0xff] }
 0x547   :  { %2128 = vmatpush3.bf16.msra.mxu0 %v2125_v16  ;;  %v1404_v16 = vld [vmem:[%s2982_s17 + $0x30] sm:$0xff] }
 0x615   :  { %v1937_v54 = vpop.f32.mrb[16].mxu0 }
 0x616   :  { %v1155_v56 = vadd.f32 %v1937_v54, %v1660_v53  ;;  %v1149_v57 = vpop.f32.mrb[17].mxu0 }
 0x617   :  { %v1150_v58 = vadd.f32 %v1660_v53, %v1149_v57  ;;  %v1666_v57 = vld [vmem:[%s2979_s14] ss:$0 sm:$0xff] }
 0x618   :  { %v2805_v55 = vadd.f32 %v1155_v56, %v2522_v2 }
 0x619   :  { %v2808_v59 = vadd.f32 %v1150_v58, %v2517_v1  ;;  %v1940_v25 = vpop.f32.mrb[18].mxu0 }
 0x61a   :  { %v1165_v60 = vadd.f32 %v1940_v25, %v1660_v53  ;;  %v1159_v61 = vpop.f32.mrb[19].mxu0  ;;  %v1175_v24 = vsel %vm122_vm0, %v2805_v55, 0.0  ;;  %v1189_v28 = vmul.f32 %v2805_v55, %v2805_v55 }
 0x61b   :  { %v1160_v62 = vadd.f32 %v1660_v53, %v1159_v61  ;;  %1176 = vadd.xlane.f32.xlu1 %v1175_v24  ;;  %v1172_v63 = vsel %vm122_vm0, %v2808_v59, 0.0  ;;  %v1188_v2 = vmul.f32 %v2808_v59, %v2808_v59 }
 0x61c   :  { %1173 = vadd.xlane.f32.xlu0 %v1172_v63  ;;  %v2819_v1 = vadd.f32 %v1165_v60, %v2512_v0  ;;  %v1195_v3 = vsel %vm122_vm0, %v1189_v28, 0.0 }
 0x61d   :  { %v2823_v4 = vadd.f32 %v1160_v62, %v2538_v9  ;;  %v1192_v5 = vsel %vm122_vm0, %v1188_v2, 0.0 }
 0x61e   :  { %v1181_v6 = vsel %vm122_vm0, %v2819_v1, 0.0  ;;  %v1191_v7 = vmul.f32 %v2819_v1, %v2819_v1 }
 0x61f   :  { %1196 = vadd.xlane.f32.xlu1 %v1195_v3  ;;  %v1178_v0 = vsel %vm122_vm0, %v2823_v4, 0.0  ;;  %v1190_v8 = vmul.f32 %v2823_v4, %v2823_v4 }
 0x620   :  { %1193 = vadd.xlane.f32.xlu0 %v1192_v5  ;;  %v1201_v9 = vsel %vm122_vm0, %v1191_v7, 0.0 }
 0x621   :  { %v1198_v10 = vsel %vm122_vm0, %v1190_v8, 0.0  ;;  %v1399_v8 = vld [vmem:[%s2982_s17 + $0x8] sm:$0xff] }
 0x623   :  { %1182 = vadd.xlane.f32.xlu1 %v1181_v6 }
 0x624   :  { %1179 = vadd.xlane.f32.xlu0 %v1178_v0  ;;  %v1398_v0 = vld [vmem:[%s2982_s17] sm:$0xff] }
 0x627   :  { %1202 = vadd.xlane.f32.xlu1 %v1201_v9  ;;  %v2129_v9 = vpack.c.bf16 %v1399_v8, %v1398_v0 }
 0x628   :  { %1199 = vadd.xlane.f32.xlu0 %v1198_v10  ;;  %v1400_v10 = vld [vmem:[%s2982_s17 + $0x10] sm:$0xff] }
 0x629   :  { %2130 = vmatprep.subr.bf16.mxu1 %v2129_v9  ;;  %v2133_v12 = vpack.c.bf16 %v1401_v11, %v1400_v10 }
 0x62a   :  { %2132 = vmatpush3.bf16.msra.mxu1 %v2129_v9 }
 0x62b   :  { %2134 = vmatprep.subr.bf16.mxu1 %v2133_v12 }
 0x62e   :  { %2136 = vmatpush3.bf16.msra.mxu1 %v2133_v12 }
 0x62f   :  { %2138 = vmatprep.subr.bf16.mxu1 %v2137_v15 }
 0x632   :  { %2140 = vmatpush3.bf16.msra.mxu1 %v2137_v15 }
 0x6a8   :  { %v1177_v17 = vpop.xlane.xlu1 %1176 }
 0x6a9   :  { %v1185_v18 = vmul.f32 0.03125, %v1177_v17  ;;  %v1174_v19 = vpop.xlane.xlu0 %1173  ;;  %v1405_v17 = vld [vmem:[%s2982_s17 + $0x38] sm:$0xff] }
 0x6aa   :  { %v1184_v20 = vmul.f32 0.03125, %v1174_v19  ;;  %v1406_v19 = vld [vmem:[%s2982_s17 + $0x40] sm:$0xff] }
 0x6ab   :  { %v1209_v22 = vmul.f32 %v1185_v18, %v1185_v18  ;;  %v1217_v40 = vsub.f32 %v2805_v55, %v1185_v18  ;;  %v2141_v18 = vpack.c.bf16 %v1405_v17, %v1404_v16  ;;  %v1672_v16 = vld [vmem:[%s2983_s18] ss:$0 sm:$0xff] }
 0x6ac   :  { %v1197_v21 = vpop.xlane.xlu1 %1196  ;;  %v1208_v27 = vmul.f32 %v1184_v20, %v1184_v20  ;;  %v1216_v39 = vsub.f32 %v2808_v59, %v1184_v20  ;;  %v1407_v20 = vld [vmem:[%s2982_s17 + $0x48] sm:$0xff] }
 0x6ad   :  { %v1205_v23 = vmul.f32 0.03125, %v1197_v21  ;;  %v1194_v26 = vpop.xlane.xlu0 %1193  ;;  %2142 = vmatprep.subr.bf16.mxu1 %v2141_v18  ;;  %v2145_v21 = vpack.c.bf16 %v1407_v20, %v1406_v19 }
 0x6ae   :  { %v1204_v29 = vmul.f32 0.03125, %v1194_v26  ;;  %2144 = vmatpush3.bf16.msra.mxu1 %v2141_v18  ;;  %v1410_v26 = vld [vmem:[%s2982_s17 + $0x60] sm:$0xff] }
 0x6af   :  { %v1213_v30 = vsub.f32 %v1205_v23, %v1209_v22  ;;  %2146 = vmatprep.subr.bf16.mxu1 %v2145_v21  ;;  %v1408_v22 = vld [vmem:[%s2982_s17 + $0x50] sm:$0xff]  ;;  %v1409_v23 = vld [vmem:[%s2982_s17 + $0x58] sm:$0xff] }
 0x6b0   :  { %v1212_v31 = vsub.f32 %v1204_v29, %v1208_v27  ;;  %v1183_v32 = vpop.xlane.xlu1 %1182  ;;  %v2149_v27 = vpack.c.bf16 %v1409_v23, %v1408_v22  ;;  %v1411_v29 = vld [vmem:[%s2982_s17 + $0x68] sm:$0xff] }
 0x6b1   :  { %v1221_v36 = vadd.f32 1e-06, %v1213_v30  ;;  %v1187_v37 = vmul.f32 0.03125, %v1183_v32  ;;  %v1180_v42 = vpop.xlane.xlu0 %1179  ;;  %v2153_v30 = vpack.c.bf16 %v1411_v29, %v1410_v26  ;;  %v1413_v32 = vld [vmem:[%s2982_s17 + $0x78] sm:$0xff] }
 0x6b2   :  { %v1220_v44 = vadd.f32 1e-06, %v1212_v31  ;;  %v1186_v45 = vmul.f32 0.03125, %v1180_v42  ;;  %2148 = vmatpush3.bf16.msra.mxu1 %v2145_v21  ;;  %v1412_v31 = vld [vmem:[%s2982_s17 + $0x70] sm:$0xff] }
 0x6b3   :  { %2192 = vrsqrt.f32 %v1221_v36  ;;  %v1211_v47 = vmul.f32 %v1187_v37, %v1187_v37  ;;  %v1219_v60 = vsub.f32 %v2819_v1, %v1187_v37  ;;  %2150 = vmatprep.subr.bf16.mxu1 %v2149_v27  ;;  %v2157_v36 = vpack.c.bf16 %v1413_v32, %v1412_v31  ;;  %v1667_v37 = vld [vmem:[%s2981_s16] ss:$0 sm:$0xff] }
 0x6b4   :  { %2194 = vrsqrt.f32 %v1220_v44  ;;  %v1203_v46 = vpop.xlane.xlu1 %1202  ;;  %v1210_v50 = vmul.f32 %v1186_v45, %v1186_v45  ;;  %v1218_v28 = vsub.f32 %v2823_v4, %v1186_v45 }
 0x6b5   :  { %v1207_v48 = vmul.f32 0.03125, %v1203_v46  ;;  %v1200_v49 = vpop.xlane.xlu0 %1199 }
 0x6b6   :  { %v1206_v51 = vmul.f32 0.03125, %v1200_v49  ;;  %2152 = vmatpush3.bf16.msra.mxu1 %v2149_v27 }
 0x6b7   :  { %v1215_v52 = vsub.f32 %v1207_v48, %v1211_v47  ;;  %2154 = vmatprep.subr.bf16.mxu1 %v2153_v30 }
 0x6b8   :  { %v1214_v35 = vsub.f32 %v1206_v51, %v1210_v50 }
 0x6b9   :  { %v1223_v33 = vadd.f32 1e-06, %v1215_v52 }
 0x6ba   :  { %v1222_v34 = vadd.f32 1e-06, %v1214_v35  ;;  %2156 = vmatpush3.bf16.msra.mxu1 %v2153_v30 }
 0x6bb   :  { %2196 = vrsqrt.f32 %v1223_v33  ;;  %2158 = vmatprep.subr.bf16.mxu1 %v2157_v36 }
 0x6bc   :  { %2198 = vrsqrt.f32 %v1222_v34 }
 0x6bd   :  { %v2193_v38 = vpop.eup %2192 }
 0x6be   :  { %v2195_v43 = vpop.eup %2194  ;;  %v1229_v53 = vmul.f32 %v2193_v38, %v1217_v40  ;;  %2160 = vmatpush3.bf16.msra.mxu1 %v2157_v36 }
 0x6bf   :  { %v1228_v54 = vmul.f32 %v2195_v43, %v1216_v39 }
 0x6c0   :  { %v1240_v56 = vmul.f32 %v1665_v41, %v1229_v53 }
 0x6c1   :  { %v1239_v58 = vmul.f32 %v1665_v41, %v1228_v54 }
 0x6c2   :  { %v1251_v61 = vadd.f32 %v1666_v57, %v1240_v56 }
 0x6c3   :  { %v1250_v25 = vadd.f32 %v1666_v57, %v1239_v58 }
 0x6c5   :  { %v2197_v24 = vpop.eup %2196  ;;  %1949 = vmatprep.mubr.msk.f32.mxu0 %vm122_vm0, %v1250_v25 }
 0x6c6   :  { %v2199_v62 = vpop.eup %2198  ;;  %1950 = vmatmul.mubr.msk.f32.vlgmr.msra.gmra.mrb[20].mxu0 %vm122_vm0, %v1251_v61  ;;  %v1231_v63 = vmul.f32 %v2197_v24, %v1219_v60 }
 0x6c7   :  { %v1230_v2 = vmul.f32 %v2199_v62, %v1218_v28 }
 0x6c8   :  { %v1242_v3 = vmul.f32 %v1665_v41, %v1231_v63 }
 0x6c9   :  { %v1241_v5 = vmul.f32 %v1665_v41, %v1230_v2 }
 0x6ca   :  { %v1253_v7 = vadd.f32 %v1666_v57, %v1242_v3 }
 0x6cb   :  { %v1252_v6 = vadd.f32 %v1666_v57, %v1241_v5 }
 0x6cd   :  { %1952 = vmatprep.mubr.msk.f32.mxu0 %vm122_vm0, %v1252_v6 }
 0x6ce   :  { %1953 = vmatmul.mubr.msk.f32.gmra.mrb[22].mxu0 %vm122_vm0, %v1253_v7 }
 0x799   :  { %v1951_v42 = vpop.f32.mrb[20].mxu0 }
 0x79a   :  { %v1349_v44 = vadd.f32 %v1951_v42, %v1667_v37  ;;  %v1343_v45 = vpop.f32.mrb[21].mxu0 }
 0x79b   :  { %v1344_v46 = vadd.f32 %v1667_v37, %v1343_v45 }
 0x79c   :  { %v1363_v47 = vmul.f32 %v1349_v44, %v1349_v44 }
 0x79d   :  { %v1362_v48 = vmul.f32 %v1344_v46, %v1344_v46 }
 0x79e   :  { %v1367_v49 = vmul.f32 %v1363_v47, %v1349_v44 }
 0x79f   :  { %v1366_v50 = vmul.f32 %v1362_v48, %v1344_v46 }
 0x7a0   :  { %v1371_v51 = vmul.f32 0.044715, %v1367_v49 }
 0x7a1   :  { %v1370_v52 = vmul.f32 0.044715, %v1366_v50  ;;  %v1954_v35 = vpop.f32.mrb[22].mxu0 }
 0x7a2   :  { %v1375_v33 = vadd.f32 %v1371_v51, %v1349_v44  ;;  %v1359_v34 = vadd.f32 %v1954_v35, %v1667_v37  ;;  %v1353_v40 = vpop.f32.mrb[23].mxu0 }
 0x7a3   :  { %v1374_v38 = vadd.f32 %v1370_v52, %v1344_v46  ;;  %v1354_v39 = vadd.f32 %v1667_v37, %v1353_v40 }
 0x7a4   :  { %v1379_v41 = vmul.f32 0.7978846, %v1375_v33  ;;  %v1365_v43 = vmul.f32 %v1359_v34, %v1359_v34 }
 0x7a5   :  { %v1378_v53 = vmul.f32 0.7978846, %v1374_v38  ;;  %v1364_v54 = vmul.f32 %v1354_v39, %v1354_v39 }
 0x7a6   :  { %2200 = vtanh.f32 %v1379_v41  ;;  %v1369_v56 = vmul.f32 %v1365_v43, %v1359_v34 }
 0x7a7   :  { %v1368_v57 = vmul.f32 %v1364_v54, %v1354_v39  ;;  %2202 = vtanh.f32 %v1378_v53 }
 0x7a8   :  { %v1373_v58 = vmul.f32 0.044715, %v1369_v56 }
 0x7a9   :  { %v1372_v25 = vmul.f32 0.044715, %v1368_v57 }
 0x7aa   :  { %v1377_v60 = vadd.f32 %v1373_v58, %v1359_v34 }
 0x7ab   :  { %v1376_v61 = vadd.f32 %v1372_v25, %v1354_v39 }
 0x7ac   :  { %v1381_v24 = vmul.f32 0.7978846, %v1377_v60 }
 0x7ad   :  { %v1380_v28 = vmul.f32 0.7978846, %v1376_v61 }
 0x7ae   :  { %2204 = vtanh.f32 %v1381_v24 }
 0x7af   :  { %2206 = vtanh.f32 %v1380_v28 }
 0x7b0   :  { %v2201_v62 = vpop.eup %2200 }
 0x7b1   :  { %v2203_v63 = vpop.eup %2202  ;;  %v1387_v2 = vadd.f32 1.0, %v2201_v62 }
 0x7b2   :  { %v1386_v3 = vadd.f32 1.0, %v2203_v63 }
 0x7b3   :  { %v1391_v5 = vmul.f32 0.5, %v1387_v2 }
 0x7b4   :  { %v1390_v6 = vmul.f32 0.5, %v1386_v3 }
 0x7b5   :  { %v1395_v0 = vmul.f32 %v1391_v5, %v1349_v44 }
 0x7b6   :  { %v1394_v7 = vmul.f32 %v1390_v6, %v1344_v46 }
 0x7b8   :  { %v2205_v8 = vpop.eup %2204  ;;  %1987 = vmatprep.mubr.f32.mxu1 %v1394_v7 }
 0x7b9   :  { %v2207_v9 = vpop.eup %2206  ;;  %1988 = vmatmul.mubr.f32.vlgmr.msra.gmra.mrb[8].mxu1 %v1395_v0  ;;  %v1389_v10 = vadd.f32 1.0, %v2205_v8  ;;  %v1673_v8 = vld [vmem:[%s2984_s19] ss:$0 sm:$0xff]  ;;  %s2340_s19 = smov [#allocation10]  }
 0x7ba   :  { %v1388_v11 = vadd.f32 1.0, %v2207_v9  ;;  %s1601_s7 = sshll.u32 %s2340_s19, 4  ;;  %s1602_s7 = int_to_ptr.vmem [resolvable:$true] %s1601_s7 }
 0x7bb   :  { %v1393_v12 = vmul.f32 0.5, %v1389_v10  ;;  %p2309_p5 = scmp.lt.s32.totalorder %s1602_s7, %s1602_s7 }
 0x7bc   :  { %v1392_v13 = vmul.f32 0.5, %v1388_v11 }
 0x7bd   :  { %v1397_v15 = vmul.f32 %v1393_v12, %v1359_v34  ;;  %v1674_v12 = vld [vmem:[%s2985_s20] ss:$0 sm:$0xff]  ;;  %s2304_s20 = scalar_lea.vmem %s1602_s7, 512 }
 0x7be   :  { %v1396_v14 = vmul.f32 %v1392_v13, %v1354_v39  ;;  %p2305_p4 = scmp.ne.s32.totalorder %s1602_s7, %s2304_s20  ;;  %p2310_p6 = scmp.lt.s32.totalorder %s2304_s20, %s2304_s20 }
 0x7c0   :  { %1990 = vmatprep.mubr.f32.mxu1 %v1396_v14  ;;  %p2311_p7 = por %p2310_p6, %p2309_p5 }
 0x7c1   :  { %1991 = vmatmul.mubr.f32.gmra.mrb[10].mxu1 %v1397_v15 }
 0x7c2   :  { %p2312_p8 = pnand %p2311_p7, %p2305_p4 }
 0x88c   :  { %v1989_v17 = vpop.f32.mrb[8].mxu1 }
 0x88d   :  { %v1493_v18 = vadd.f32 %v1989_v17, %v1672_v16  ;;  %v1487_v19 = vpop.f32.mrb[9].mxu1 }
 0x88e   :  { %v1488_v20 = vadd.f32 %v1672_v16, %v1487_v19 }
 0x88f   :  { %v2905_v21 = vadd.f32 %v1493_v18, %v2805_v55 }
 0x890   :  { %v2908_v22 = vadd.f32 %v1488_v20, %v2808_v59 }
 0x891   :  { %v1513_v23 = vsel %vm122_vm0, %v2905_v21, 0.0  ;;  %v1527_v26 = vmul.f32 %v2905_v21, %v2905_v21 }
 0x892   :  { %1514 = vadd.xlane.f32.xlu1 %v1513_v23  ;;  %v1510_v27 = vsel %vm122_vm0, %v2908_v22, 0.0  ;;  %v1526_v29 = vmul.f32 %v2908_v22, %v2908_v22 }
 0x893   :  { %1511 = vadd.xlane.f32.xlu0 %v1510_v27  ;;  %v1533_v59 = vsel %vm122_vm0, %v1527_v26, 0.0 }
 0x894   :  { %v1992_v30 = vpop.f32.mrb[10].mxu1  ;;  %v1530_v36 = vsel %vm122_vm0, %v1526_v29, 0.0 }
 0x895   :  { %v1503_v55 = vadd.f32 %v1992_v30, %v1672_v16  ;;  %v1497_v31 = vpop.f32.mrb[11].mxu1 }
 0x896   :  { %v1498_v32 = vadd.f32 %v1672_v16, %v1497_v31  ;;  %1534 = vadd.xlane.f32.xlu1 %v1533_v59 }
 0x897   :  { %v2921_v37 = vadd.f32 %v1503_v55, %v2819_v1  ;;  %1531 = vadd.xlane.f32.xlu0 %v1530_v36 }
 0x898   :  { %v2924_v42 = vadd.f32 %v1498_v32, %v2823_v4 }
 0x899   :  { %v1519_v44 = vsel %vm122_vm0, %v2921_v37, 0.0  ;;  %v1529_v45 = vmul.f32 %v2921_v37, %v2921_v37 }
 0x89a   :  { %1520 = vadd.xlane.f32.xlu1 %v1519_v44  ;;  %v1516_v46 = vsel %vm122_vm0, %v2924_v42, 0.0  ;;  %v1528_v47 = vmul.f32 %v2924_v42, %v2924_v42 }
 0x89b   :  { %1517 = vadd.xlane.f32.xlu0 %v1516_v46  ;;  %v1539_v1 = vsel %vm122_vm0, %v1529_v45, 0.0 }
 0x89c   :  { %v1536_v4 = vsel %vm122_vm0, %v1528_v47, 0.0 }
 0x89e   :  { %1540 = vadd.xlane.f32.xlu1 %v1539_v1 }
 0x89f   :  { %1537 = vadd.xlane.f32.xlu0 %v1536_v4 }
 0x91f   :  { %v1515_v48 = vpop.xlane.xlu1 %1514 }
 0x920   :  { %v1523_v49 = vmul.f32 0.03125, %v1515_v48  ;;  %v1512_v50 = vpop.xlane.xlu0 %1511 }
 0x921   :  { %v1522_v51 = vmul.f32 0.03125, %v1512_v50 }
 0x922   :  { %v1547_v35 = vmul.f32 %v1523_v49, %v1523_v49  ;;  %v1555_v6 = vsub.f32 %v2905_v21, %v1523_v49 }
 0x923   :  { %v1535_v52 = vpop.xlane.xlu1 %1534  ;;  %v1546_v40 = vmul.f32 %v1522_v51, %v1522_v51  ;;  %v1554_v0 = vsub.f32 %v2908_v22, %v1522_v51 }
 0x924   :  { %v1543_v33 = vmul.f32 0.03125, %v1535_v52  ;;  %v1532_v34 = vpop.xlane.xlu0 %1531 }
 0x925   :  { %v1542_v38 = vmul.f32 0.03125, %v1532_v34 }
 0x926   :  { %v1551_v39 = vsub.f32 %v1543_v33, %v1547_v35 }
 0x927   :  { %v1550_v41 = vsub.f32 %v1542_v38, %v1546_v40  ;;  %v1521_v43 = vpop.xlane.xlu1 %1520 }
 0x928   :  { %v1559_v53 = vadd.f32 1e-06, %v1551_v39  ;;  %v1525_v54 = vmul.f32 0.03125, %v1521_v43  ;;  %v1518_v56 = vpop.xlane.xlu0 %1517 }
 0x929   :  { %v1558_v57 = vadd.f32 1e-06, %v1550_v41  ;;  %v1524_v58 = vmul.f32 0.03125, %v1518_v56 }
 0x92a   :  { %2208 = vrsqrt.f32 %v1559_v53  ;;  %v1549_v60 = vmul.f32 %v1525_v54, %v1525_v54  ;;  %v1557_v17 = vsub.f32 %v2921_v37, %v1525_v54 }
 0x92b   :  { %2210 = vrsqrt.f32 %v1558_v57  ;;  %v1541_v25 = vpop.xlane.xlu1 %1540  ;;  %v1548_v28 = vmul.f32 %v1524_v58, %v1524_v58  ;;  %v1556_v19 = vsub.f32 %v2924_v42, %v1524_v58 }
 0x92c   :  { %v1545_v61 = vmul.f32 0.03125, %v1541_v25  ;;  %v1538_v24 = vpop.xlane.xlu0 %1537 }
 0x92d   :  { %v1544_v62 = vmul.f32 0.03125, %v1538_v24 }
 0x92e   :  { %v1553_v63 = vsub.f32 %v1545_v61, %v1549_v60 }
 0x92f   :  { %v1552_v2 = vsub.f32 %v1544_v62, %v1548_v28 }
 0x930   :  { %v1561_v3 = vadd.f32 1e-06, %v1553_v63 }
 0x931   :  { %v1560_v5 = vadd.f32 1e-06, %v1552_v2 }
 0x932   :  { %2212 = vrsqrt.f32 %v1561_v3 }
 0x933   :  { %2214 = vrsqrt.f32 %v1560_v5 }
 0x934   :  { %v2209_v7 = vpop.eup %2208 }
 0x935   :  { %v2211_v9 = vpop.eup %2210  ;;  %v1567_v10 = vmul.f32 %v2209_v7, %v1555_v6 }
 0x936   :  { %v1566_v11 = vmul.f32 %v2211_v9, %v1554_v0 }
 0x937   :  { %v1578_v13 = vmul.f32 %v1673_v8, %v1567_v10 }
 0x938   :  { %v1577_v14 = vmul.f32 %v1673_v8, %v1566_v11 }
 0x939   :  { %v1589_v15 = vadd.f32 %v1674_v12, %v1578_v13 }
 0x93a   :  { %v1588_v16 = vadd.f32 %v1674_v12, %v1577_v14 }
 0x93b   :  { %1593 = vst.msk [vmem:[#allocation10 + $0x8] sm:$0xff] %vm122_vm0, %v1589_v15 }
 0x93c   :  { %v2213_v18 = vpop.eup %2212  ;;  %1592 = vst.msk [vmem:[#allocation10] sm:$0xff] %vm122_vm0, %v1588_v16 }
 0x93d   :  { %v2215_v20 = vpop.eup %2214  ;;  %v1569_v21 = vmul.f32 %v2213_v18, %v1557_v17 }
 0x93e   :  { %v1568_v22 = vmul.f32 %v2215_v20, %v1556_v19 }
 0x93f   :  { %v1580_v23 = vmul.f32 %v1673_v8, %v1569_v21 }
 0x940   :  { %v1579_v26 = vmul.f32 %v1673_v8, %v1568_v22 }
 0x941   :  { %v1591_v27 = vadd.f32 %v1674_v12, %v1580_v23 }
 0x942   :  { %v1590_v29 = vadd.f32 %v1674_v12, %v1579_v26 }
 0x943   :  { %1595 = vst.msk [vmem:[#allocation10 + $0x18] sm:$0xff] %vm122_vm0, %v1591_v27 }
 0x944   :  { %1594 = vst.msk [vmem:[#allocation10 + $0x10] sm:$0xff] %vm122_vm0, %v1590_v29 }
 0x945   :  { %2315 = shalt.err (!%p2312_p8)
}
 0x946   :  { %s2316_s11 = scalar_lea.hbm %s2986_s21, 512 }
 0x947   :  { %p2317_p9 = scmp.ne.s32.totalorder %s2986_s21, %s2316_s11  ;;  %p2320_p10 = scmp.lt.u32.totalorder %s2316_s11, %s2986_s21 }
 0x949   :  { %p2322_p11 = pnand %p2320_p10, %p2317_p9 }
 0x94b   :  { %2325 = shalt.err (!%p2322_p11)
}
 0x94c   :  { %1607 = dma.vmem_to_hbm [thread:$0]  %s1602_s7, 512, %s2986_s21, [#allocation4], %s2338_s8, %s2338_s8, %s2339_s1  }
 0x94d   :  { %2332 = dma.done.wait [#allocation4], 512  }
 0x94e   :  { %2333 = vsyncadd [#allocation4], 4294966784 }
 0x94f   :  { %1611 = vsyncpa [#allocation3], 1 }
 0x950   :  { %1612 = vsyncpa [#allocation6], 1 }
 0x951   :  { %1613 = vsyncpa [#allocation9], 1 }
 0x952   :  { %1614 = vsyncpa [#allocation4], 1 }

</bundles_post_ra>
